<compile_context>
chip_gen: v6e
topology: v6e:2x2x1
jax: 0.10.0
libtpu: 0.0.40
codegen_flags: <defaults>
</compile_context>

<pallas_src>
import functools

import jax
import jax.numpy as jnp
from jax.experimental import pallas as pl
from jax.experimental.pallas import tpu as pltpu


# ------------------------------- Pallas kernel ------------------------------ #

def _resblock_kernel(x_ref, w1_ref, b1_ref, w2_ref, b2_ref, o_ref, *,
                     res_scale, img_h):
    """Fused conv1+ReLU+conv2+residual for one (image, row-tile) block.

    x_ref : (1, TH+4, W+2, C)  zero-padded input tile (2-row / 1-col halo)
    w1_ref: (9C, C)            conv1 weights, rows ordered tap-major (kh*3+kw, ci)
    b1_ref: (1, C)
    w2_ref: (9C, C)            conv2 weights
    b2_ref: (1, C)
    o_ref : (1, TH, W, C)
    """
    th = o_ref.shape[1]
    w = o_ref.shape[2]
    c = o_ref.shape[3]
    r1 = th + 2                     # conv1 output rows (1-row halo each side)
    t = pl.program_id(1)            # row-tile index

    xt = x_ref[0]                   # (TH+4, W+2, C), VMEM resident

    # ---- conv1 + bias + ReLU as a single K=9C matmul (im2col built in VMEM) ----
    lhs1 = jnp.concatenate(
        [xt[dy:dy + r1, dx:dx + w, :] for dy in range(3) for dx in range(3)],
        axis=-1).reshape(r1 * w, 9 * c)
    h1 = jnp.dot(lhs1, w1_ref[...], preferred_element_type=jnp.float32)
    h1 = jnp.maximum(h1 + b1_ref[...], 0.0).reshape(r1, w, c)

    # conv2 zero-pads h1 at the image border: kill halo rows outside [0, img_h).
    grow = t * th - 1 + jax.lax.broadcasted_iota(jnp.int32, (r1, w, c), 0)
    h1 = jnp.where((grow >= 0) & (grow < img_h), h1, 0.0)

    # zero-pad W by 1 on each side for conv2 (in VMEM).
    zcol = jnp.zeros((r1, 1, c), jnp.float32)
    h1p = jnp.concatenate([zcol, h1, zcol], axis=1)          # (r1, W+2, C)

    # ---- conv2 + bias as a single K=9C matmul ----
    lhs2 = jnp.concatenate(
        [h1p[dy:dy + th, dx:dx + w, :] for dy in range(3) for dx in range(3)],
        axis=-1).reshape(th * w, 9 * c)
    y = jnp.dot(lhs2, w2_ref[...], preferred_element_type=jnp.float32)
    y = (y + b2_ref[...]).reshape(th, w, c)

    # ---- residual: identity is the interior of the padded input tile ----
    identity = xt[2:th + 2, 1:w + 1, :]
    o_ref[0] = (identity + res_scale * y).astype(o_ref.dtype)


# -------------------------------- JAX wrapper -------------------------------- #

def _weight_matrix(w_oihw):
    """PyTorch (O, I, 3, 3) -> (9*I, O); row index = (kh*3 + kw)*I + i."""
    o, i, kh, kw = w_oihw.shape
    return jnp.transpose(w_oihw, (2, 3, 1, 0)).reshape(kh * kw * i, o)


def _pick_row_tile(h, w, c, vmem_budget=12 << 20):
    """Largest divisor of h whose fused per-step working set fits the budget."""
    for th in sorted((d for d in range(1, h + 1) if h % d == 0), reverse=True):
        est = 4 * (2 * (th + 4) * (w + 2) * c       # double-buffered input tile
                   + 2 * th * w * c                 # double-buffered output tile
                   + (th + 2) * w * 9 * c           # conv1 im2col
                   + (th + 2) * (w + 2) * c         # padded conv1 output
                   + th * w * 9 * c                 # conv2 im2col
                   + 4 * 9 * c * c + 4 * c)         # weights + biases
        if est <= vmem_budget:
            return th
    return 1


def residual_block_no_bn(x_nchw, w1, b1, w2, b2, res_scale=1.0, row_tile=None):
    """Forward pass of ResidualBlockNoBN. x_nchw: (N, C, H, W) float32."""
    n, c, h, w = x_nchw.shape
    x = jnp.transpose(x_nchw, (0, 2, 3, 1)).astype(jnp.float32)    # NHWC

    th = _pick_row_tile(h, w, c) if row_tile is None else int(row_tile)
    if h % th != 0:
        th = max(d for d in range(1, th + 1) if h % d == 0)
    nt = h // th

    # Zero pad: 2 rows each side (so conv1 can produce conv2's 1-row halo),
    # 1 col each side (conv1 "same" padding in W).
    xp = jnp.pad(x, ((0, 0), (2, 2), (1, 1), (0, 0)))              # (N, H+4, W+2, C)
    # Overlapping row tiles with a 4-row halo (tiny duplication, built once).
    xt = jnp.stack([xp[:, t * th:t * th + th + 4] for t in range(nt)], axis=1)
    xt = xt.reshape(n * nt, th + 4, w + 2, c)

    w1m = _weight_matrix(w1).astype(jnp.float32)                   # (9C, C)
    w2m = _weight_matrix(w2).astype(jnp.float32)
    b1r = b1.reshape(1, c).astype(jnp.float32)
    b2r = b2.reshape(1, c).astype(jnp.float32)

    kernel = functools.partial(_resblock_kernel,
                               res_scale=float(res_scale), img_h=h)

    out = pl.pallas_call(
        kernel,
        out_shape=jax.ShapeDtypeStruct((n, h, w, c), jnp.float32),
        grid=(n, nt),
        in_specs=[
            # padded activation row-tile (only activation stream read from HBM)
            pl.BlockSpec((1, th + 4, w + 2, c),
                         lambda i, t: (i * nt + t, 0, 0, 0)),
            # weights / biases: constant index map -> fetched once, VMEM resident
            pl.BlockSpec((9 * c, c), lambda i, t: (0, 0)),
            pl.BlockSpec((1, c), lambda i, t: (0, 0)),
            pl.BlockSpec((9 * c, c), lambda i, t: (0, 0)),
            pl.BlockSpec((1, c), lambda i, t: (0, 0)),
        ],
        out_specs=pl.BlockSpec((1, th, w, c), lambda i, t: (i, t, 0, 0)),
        compiler_params=pltpu.CompilerParams(
            dimension_semantics=("parallel", "parallel")),
    )(xt, w1m, b1r, w2m, b2r)

    return jnp.transpose(out, (0, 3, 1, 2))                        # back to NCHW


# ------------------------- reference (plain JAX/XLA) ------------------------- #

def _reference(x_nchw, w1, b1, w2, b2, res_scale):
    dn = ("NCHW", "OIHW", "NCHW")
    conv = lambda x, w: jax.lax.conv_general_dilated(
        x, w, window_strides=(1, 1), padding=((1, 1), (1, 1)),
        dimension_numbers=dn, precision=jax.lax.Precision.HIGHEST)
    h = jax.nn.relu(conv(x_nchw, w1) + b1.reshape(1, -1, 1, 1))
    out = conv(h, w2) + b2.reshape(1, -1, 1, 1)
    return x_nchw + out * res_scale


# ----------------------------------- main ------------------------------------ #

if __name__ == "__main__":
    # ResidualBlockNoBN(num_feat=64) default channel count, small spatial size.
    N, C, H, W = 2, 64, 16, 16
    res_scale = 0.2

    key = jax.random.PRNGKey(0)
    kx, k1, k2 = jax.random.split(key, 3)

    x = jax.random.normal(kx, (N, C, H, W), dtype=jnp.float32)

    # default_init_weights: kaiming_normal_ (fan_in, gain=sqrt(2)) * 0.1; constant bias fill.
    fan_in = C * 3 * 3
    std = (2.0 / fan_in) ** 0.5
    w1 = jax.random.normal(k1, (C, C, 3, 3), dtype=jnp.float32) * std * 0.1
    w2 = jax.random.normal(k2, (C, C, 3, 3), dtype=jnp.float32) * std * 0.1
    b1 = jnp.full((C,), 0.02, jnp.float32)    # nonzero fill to exercise the bias path
    b2 = jnp.full((C,), -0.01, jnp.float32)

    # row_tile=8 -> 2 row tiles per image: exercises halo + border-masking logic.
    out = residual_block_no_bn(x, w1, b1, w2, b2, res_scale, row_tile=8)
    out = jax.block_until_ready(out)

    ref = _reference(x, w1, b1, w2, b2, res_scale)
    assert out.shape == (N, C, H, W) and out.dtype == jnp.float32
    max_err = float(jnp.max(jnp.abs(out - ref)))
    assert jnp.allclose(out, ref, atol=2e-3, rtol=2e-3), max_err

    print("KERNEL_OK")
</pallas_src>

<mosaic_0001>
module attributes {stable_mosaic.version = 11 : i64} {
  func.func @_resblock_kernel(%arg0: i32, %arg1: i32, %arg2: memref<1x12x18x64xf32, #tpu.memory_space<vmem>>, %arg3: memref<576x64xf32, #tpu.memory_space<vmem>>, %arg4: memref<1x64xf32, #tpu.memory_space<vmem>>, %arg5: memref<576x64xf32, #tpu.memory_space<vmem>>, %arg6: memref<1x64xf32, #tpu.memory_space<vmem>>, %arg7: memref<1x8x16x64xf32, #tpu.memory_space<vmem>>) attributes {dimension_semantics = [#tpu.dimension_semantics<parallel>, #tpu.dimension_semantics<parallel>], iteration_bounds = array<i64: 2, 2>, scalar_prefetch = 0 : i64, scratch_operands = 0 : i64, tpu.core_type = #tpu.core_type<tc>, window_params = [{transform_indices = @transform_0, window_bounds = array<i64: 1, 12, 18, 64>}, {pipeline_mode = #tpu.pipeline_mode<synchronous>, transform_indices = @transform_1, window_bounds = array<i64: 576, 64>}, {pipeline_mode = #tpu.pipeline_mode<synchronous>, transform_indices = @transform_2, window_bounds = array<i64: 1, 64>}, {pipeline_mode = #tpu.pipeline_mode<synchronous>, transform_indices = @transform_3, window_bounds = array<i64: 576, 64>}, {pipeline_mode = #tpu.pipeline_mode<synchronous>, transform_indices = @transform_4, window_bounds = array<i64: 1, 64>}, {transform_indices = @transform_5, window_bounds = array<i64: 1, 8, 16, 64>}]} {
    %c0 = arith.constant 0 : index
    %c0_0 = arith.constant 0 : index
    %c0_1 = arith.constant 0 : index
    %c0_2 = arith.constant 0 : index
    %0 = vector.load %arg2[%c0, %c0_0, %c0_1, %c0_2] : memref<1x12x18x64xf32, #tpu.memory_space<vmem>>, vector<1x12x18x64xf32>
    %1 = vector.shape_cast %0 : vector<1x12x18x64xf32> to vector<12x18x64xf32>
    %2 = vector.extract_strided_slice %1 {offsets = [0, 0, 0], sizes = [10, 16, 64], strides = [1, 1, 1]} : vector<12x18x64xf32> to vector<10x16x64xf32>
    %3 = vector.extract_strided_slice %1 {offsets = [0, 1, 0], sizes = [10, 16, 64], strides = [1, 1, 1]} : vector<12x18x64xf32> to vector<10x16x64xf32>
    %4 = vector.extract_strided_slice %1 {offsets = [0, 2, 0], sizes = [10, 16, 64], strides = [1, 1, 1]} : vector<12x18x64xf32> to vector<10x16x64xf32>
    %5 = vector.extract_strided_slice %1 {offsets = [1, 0, 0], sizes = [10, 16, 64], strides = [1, 1, 1]} : vector<12x18x64xf32> to vector<10x16x64xf32>
    %6 = vector.extract_strided_slice %1 {offsets = [1, 1, 0], sizes = [10, 16, 64], strides = [1, 1, 1]} : vector<12x18x64xf32> to vector<10x16x64xf32>
    %7 = vector.extract_strided_slice %1 {offsets = [1, 2, 0], sizes = [10, 16, 64], strides = [1, 1, 1]} : vector<12x18x64xf32> to vector<10x16x64xf32>
    %8 = vector.extract_strided_slice %1 {offsets = [2, 0, 0], sizes = [10, 16, 64], strides = [1, 1, 1]} : vector<12x18x64xf32> to vector<10x16x64xf32>
    %9 = vector.extract_strided_slice %1 {offsets = [2, 1, 0], sizes = [10, 16, 64], strides = [1, 1, 1]} : vector<12x18x64xf32> to vector<10x16x64xf32>
    %10 = vector.extract_strided_slice %1 {offsets = [2, 2, 0], sizes = [10, 16, 64], strides = [1, 1, 1]} : vector<12x18x64xf32> to vector<10x16x64xf32>
    %11 = tpu.concatenate %2, %3, %4, %5, %6, %7, %8, %9, %10 in 2 : vector<10x16x64xf32>, vector<10x16x64xf32>, vector<10x16x64xf32>, vector<10x16x64xf32>, vector<10x16x64xf32>, vector<10x16x64xf32>, vector<10x16x64xf32>, vector<10x16x64xf32>, vector<10x16x64xf32> -> vector<10x16x576xf32>
    %12 = vector.shape_cast %11 : vector<10x16x576xf32> to vector<160x576xf32>
    %c0_3 = arith.constant 0 : index
    %c0_4 = arith.constant 0 : index
    %13 = vector.load %arg3[%c0_3, %c0_4] : memref<576x64xf32, #tpu.memory_space<vmem>>, vector<576x64xf32>
    %cst = arith.constant dense<0.000000e+00> : vector<160x64xf32>
    %14 = tpu.matmul %12, %13, %cst {dimension_numbers = #tpu.dot_dimension_numbers<[1], [0], [0], [1], [0, 0, 1, 1], [], []>} : vector<160x576xf32>, vector<576x64xf32>, vector<160x64xf32> -> vector<160x64xf32>
    %c0_5 = arith.constant 0 : index
    %c0_6 = arith.constant 0 : index
    %15 = vector.load %arg4[%c0_5, %c0_6] : memref<1x64xf32, #tpu.memory_space<vmem>>, vector<1x64xf32>
    %16 = vector.broadcast %15 : vector<1x64xf32> to vector<160x64xf32>
    %17 = arith.addf %14, %16 : vector<160x64xf32>
    %cst_7 = arith.constant 0.000000e+00 : f32
    %18 = vector.broadcast %cst_7 : f32 to vector<160x64xf32>
    %19 = arith.maximumf %17, %18 : vector<160x64xf32>
    %20 = vector.shape_cast %19 : vector<160x64xf32> to vector<10x16x64xf32>
    %c8_i32 = arith.constant 8 : i32
    %21 = arith.muli %arg1, %c8_i32 : i32
    %c1_i32 = arith.constant 1 : i32
    %22 = arith.subi %21, %c1_i32 : i32
    %23 = tpu.iota {dimensions = array<i32: 0>} : vector<10x16x64xi32>
    %24 = vector.broadcast %22 : i32 to vector<10x16x64xi32>
    %25 = arith.addi %24, %23 : vector<10x16x64xi32>
    %c0_i32 = arith.constant 0 : i32
    %26 = vector.broadcast %c0_i32 : i32 to vector<10x16x64xi32>
    %27 = arith.cmpi sge, %25, %26 : vector<10x16x64xi32>
    %c16_i32 = arith.constant 16 : i32
    %28 = vector.broadcast %c16_i32 : i32 to vector<10x16x64xi32>
    %29 = arith.cmpi slt, %25, %28 : vector<10x16x64xi32>
    %30 = arith.andi %27, %29 : vector<10x16x64xi1>
    %cst_8 = arith.constant 0.000000e+00 : f32
    %31 = vector.broadcast %cst_8 : f32 to vector<10x16x64xf32>
    %32 = arith.select %30, %20, %31 : vector<10x16x64xi1>, vector<10x16x64xf32>
    %cst_9 = arith.constant 0.000000e+00 : f32
    %33 = vector.broadcast %cst_9 : f32 to vector<10x1x64xf32>
    %34 = tpu.concatenate %33, %32, %33 in 1 : vector<10x1x64xf32>, vector<10x16x64xf32>, vector<10x1x64xf32> -> vector<10x18x64xf32>
    %35 = vector.extract_strided_slice %34 {offsets = [0, 0, 0], sizes = [8, 16, 64], strides = [1, 1, 1]} : vector<10x18x64xf32> to vector<8x16x64xf32>
    %36 = vector.extract_strided_slice %34 {offsets = [0, 1, 0], sizes = [8, 16, 64], strides = [1, 1, 1]} : vector<10x18x64xf32> to vector<8x16x64xf32>
    %37 = vector.extract_strided_slice %34 {offsets = [0, 2, 0], sizes = [8, 16, 64], strides = [1, 1, 1]} : vector<10x18x64xf32> to vector<8x16x64xf32>
    %38 = vector.extract_strided_slice %34 {offsets = [1, 0, 0], sizes = [8, 16, 64], strides = [1, 1, 1]} : vector<10x18x64xf32> to vector<8x16x64xf32>
    %39 = vector.extract_strided_slice %34 {offsets = [1, 1, 0], sizes = [8, 16, 64], strides = [1, 1, 1]} : vector<10x18x64xf32> to vector<8x16x64xf32>
    %40 = vector.extract_strided_slice %34 {offsets = [1, 2, 0], sizes = [8, 16, 64], strides = [1, 1, 1]} : vector<10x18x64xf32> to vector<8x16x64xf32>
    %41 = vector.extract_strided_slice %34 {offsets = [2, 0, 0], sizes = [8, 16, 64], strides = [1, 1, 1]} : vector<10x18x64xf32> to vector<8x16x64xf32>
    %42 = vector.extract_strided_slice %34 {offsets = [2, 1, 0], sizes = [8, 16, 64], strides = [1, 1, 1]} : vector<10x18x64xf32> to vector<8x16x64xf32>
    %43 = vector.extract_strided_slice %34 {offsets = [2, 2, 0], sizes = [8, 16, 64], strides = [1, 1, 1]} : vector<10x18x64xf32> to vector<8x16x64xf32>
    %44 = tpu.concatenate %35, %36, %37, %38, %39, %40, %41, %42, %43 in 2 : vector<8x16x64xf32>, vector<8x16x64xf32>, vector<8x16x64xf32>, vector<8x16x64xf32>, vector<8x16x64xf32>, vector<8x16x64xf32>, vector<8x16x64xf32>, vector<8x16x64xf32>, vector<8x16x64xf32> -> vector<8x16x576xf32>
    %45 = vector.shape_cast %44 : vector<8x16x576xf32> to vector<128x576xf32>
    %c0_10 = arith.constant 0 : index
    %c0_11 = arith.constant 0 : index
    %46 = vector.load %arg5[%c0_10, %c0_11] : memref<576x64xf32, #tpu.memory_space<vmem>>, vector<576x64xf32>
    %cst_12 = arith.constant dense<0.000000e+00> : vector<128x64xf32>
    %47 = tpu.matmul %45, %46, %cst_12 {dimension_numbers = #tpu.dot_dimension_numbers<[1], [0], [0], [1], [0, 0, 1, 1], [], []>} : vector<128x576xf32>, vector<576x64xf32>, vector<128x64xf32> -> vector<128x64xf32>
    %c0_13 = arith.constant 0 : index
    %c0_14 = arith.constant 0 : index
    %48 = vector.load %arg6[%c0_13, %c0_14] : memref<1x64xf32, #tpu.memory_space<vmem>>, vector<1x64xf32>
    %49 = vector.broadcast %48 : vector<1x64xf32> to vector<128x64xf32>
    %50 = arith.addf %47, %49 : vector<128x64xf32>
    %51 = vector.shape_cast %50 : vector<128x64xf32> to vector<8x16x64xf32>
    %52 = vector.extract_strided_slice %1 {offsets = [2, 1, 0], sizes = [8, 16, 64], strides = [1, 1, 1]} : vector<12x18x64xf32> to vector<8x16x64xf32>
    %cst_15 = arith.constant 2.000000e-01 : f32
    %53 = vector.broadcast %cst_15 : f32 to vector<8x16x64xf32>
    %54 = arith.mulf %53, %51 : vector<8x16x64xf32>
    %55 = arith.addf %52, %54 : vector<8x16x64xf32>
    %c0_16 = arith.constant 0 : index
    %c0_17 = arith.constant 0 : index
    %c0_18 = arith.constant 0 : index
    %c0_19 = arith.constant 0 : index
    %56 = vector.load %arg7[%c0_16, %c0_17, %c0_18, %c0_19] : memref<1x8x16x64xf32, #tpu.memory_space<vmem>>, vector<1x8x16x64xf32>
    %57 = vector.shape_cast %56 : vector<1x8x16x64xf32> to vector<8x16x64xf32>
    %58 = vector.shape_cast %55 : vector<8x16x64xf32> to vector<1x8x16x64xf32>
    tpu.vector_store %arg7[%c0_16, %c0_17, %c0_18, %c0_19], %58 {strides = array<i32>} : memref<1x8x16x64xf32, #tpu.memory_space<vmem>>, vector<1x8x16x64xf32>,
    return
  }
  func.func @transform_0(%arg0: i32, %arg1: i32) -> (i32, i32, i32, i32) {
    %c2_i32 = arith.constant 2 : i32
    %0 = arith.muli %arg0, %c2_i32 : i32
    %1 = arith.addi %0, %arg1 : i32
    %c0_i32 = arith.constant 0 : i32
    %c0_i32_0 = arith.constant 0 : i32
    %c0_i32_1 = arith.constant 0 : i32
    %c0_i32_2 = arith.constant 0 : i32
    return %1, %c0_i32, %c0_i32_0, %c0_i32_1 : i32, i32, i32, i32
  }
  func.func @transform_1(%arg0: i32, %arg1: i32) -> (i32, i32) {
    %c0_i32 = arith.constant 0 : i32
    %c0_i32_0 = arith.constant 0 : i32
    %c0_i32_1 = arith.constant 0 : i32
    return %c0_i32, %c0_i32_0 : i32, i32
  }
  func.func @transform_2(%arg0: i32, %arg1: i32) -> (i32, i32) {
    %c0_i32 = arith.constant 0 : i32
    %c0_i32_0 = arith.constant 0 : i32
    %c0_i32_1 = arith.constant 0 : i32
    return %c0_i32, %c0_i32_0 : i32, i32
  }
  func.func @transform_3(%arg0: i32, %arg1: i32) -> (i32, i32) {
    %c0_i32 = arith.constant 0 : i32
    %c0_i32_0 = arith.constant 0 : i32
    %c0_i32_1 = arith.constant 0 : i32
    return %c0_i32, %c0_i32_0 : i32, i32
  }
  func.func @transform_4(%arg0: i32, %arg1: i32) -> (i32, i32) {
    %c0_i32 = arith.constant 0 : i32
    %c0_i32_0 = arith.constant 0 : i32
    %c0_i32_1 = arith.constant 0 : i32
    return %c0_i32, %c0_i32_0 : i32, i32
  }
  func.func @transform_5(%arg0: i32, %arg1: i32) -> (i32, i32, i32, i32) {
    %c0_i32 = arith.constant 0 : i32
    %c0_i32_0 = arith.constant 0 : i32
    %c0_i32_1 = arith.constant 0 : i32
    return %arg0, %arg1, %c0_i32, %c0_i32_0 : i32, i32, i32, i32
  }
}

</mosaic_0001>

<bundles_post_ra>
// kernel: tpu_custom_call.1
= control target key start
LH: loop header
LB: loop body
LE: loop exit
PB: predicated region body
PF: predicated region fallthrough
CT: control target
= control target key end

     0   :  { %10 = vsyncpa [#allocation3], 0  ;;  %s5765_s0 = inlined_call_operand.vmem [shape: f32[4,12,18,64], index: 0, kind: input, shape index: {}]   ;;  %s5766_s1 = inlined_call_operand.vmem [shape: f32[576,64], index: 1, kind: input, shape index: {}]   ;;  %s5767_s2 = inlined_call_operand.vmem [shape: f32[1,64], index: 2, kind: input, shape index: {}]   ;;  %s5768_s3 = inlined_call_operand.vmem [shape: f32[576,64], index: 3, kind: input, shape index: {}]   ;;  %s5769_s4 = inlined_call_operand.vmem [shape: f32[1,64], index: 4, kind: input, shape index: {}]   ;;  %s5770_s5 = inlined_call_operand.hbm [shape: f32[2,16,16,64], index: 5, kind: output, shape index: {}]  }
   0x1   :  { %12 = vsyncpa [#allocation3 + $0x1], 0  ;;  %s3494_s18 = smov 0   ;;  %s3496_s19 = smov 0  }
   0x2   :  { %s3498_s20 = smov 0   ;;  %s3500_s21 = smov 0  }
   0x3   :  { %s3502_s22 = smov 0   ;;  %s3504_s23 = smov 0  }
   0x4   :  { %s3506_s24 = smov 0   ;;  %s3508_s25 = smov 0  }
   0x5 LB: > { %s2669_s26 = sadd.s32 4294967295, %s3457_s25   ;;  %s2670_s27 = sadd.s32 4294967294, %s3457_s25   ;;  %s3457_s25 = sphi %s3508_s25, %s18_s25   ;;  %s3453_s24 = sphi %s3506_s24, %s5876_s24   ;;  %s3449_s23 = sphi %s3504_s23, %s5875_s23   ;;  %s3445_s22 = sphi %s3502_s22, %s5874_s22   ;;  %s3441_s21 = sphi %s3500_s21, %s5873_s21   ;;  %s3437_s20 = sphi %s3498_s20, %s5872_s20   ;;  %s3433_s19 = sphi %s3496_s19, %s5871_s19   ;;  %s3429_s18 = sphi %s3494_s18, %s5870_s18  }
   0x6   : > { %s27_s28 = sadd.s32 1, %s3449_s23  ;;  %s30_s29 = sadd.s32 1, %s3453_s24 }
   0x7   : > { %p28_p0 = scmp.ge.s32.totalorder %s27_s28, 2  ;;  %p163_p1 = scmp.ne.s32.totalorder %s3437_s20, %s3433_s19 }
   0x8   : > { %p164_p2 = scmp.eq.s32.totalorder %s2669_s26, 3  ;;  %p169_p5 = scmp.ne.s32.totalorder %s3433_s19, %s3429_s18 }
   0x9   : > { %s5878_s28 = smov (%p28_p0, %s27_s28), 0  ;;  %s5880_s29 = smov (!%p28_p0, %s30_s29), %s3453_s24 }
   0xa   : > { %s149_s30 = ssub.s32 %s3449_s23, %s5878_s28  ;;  %p3545_p3 = por %p164_p2, %p163_p1 }
   0xb   : > { %p32_p4 = scmp.ge.s32.totalorder %s5880_s29, 2  ;;  %p170_p6 = scmp.eq.s32.totalorder %s2670_s27, 3 }
   0xc   : > { %p2675_p7 = scmp.ge.s32.totalorder %s3457_s25, 1  ;;  %p212_p9 = scmp.lt.s32.totalorder %s3457_s25, 5 }
   0xd   : > { %s5882_s29 = smov (%p32_p4, %s5880_s29), 0  ;;  %p3554_p8 = por %p170_p6, %p169_p5 }
   0xe   : > { %s148_s8 = ssub.s32 %s3453_s24, %s5882_s29  ;;  %s153_s9 = sadd.s32 1, %s3437_s20 }
   0xf   : > { %s150_s10 = sor.u32 %s149_s30, %s148_s8  ;;  %p213_p10 = pnand %p2675_p7, %p212_p9 }
  0x10   : > { %p151_p11 = scmp.eq.s32.totalorder %s150_s10, 0 }
  0x11   : > { %216 = sbr.rel (%p213_p10) target bundleno = 878 (0x36e), region = 40 }
  0x12   : > { %s3563_s11 = scalar_select %p151_p11, %s3437_s20, %s153_s9  }
  0x16   : > { %s2677_s12 = sshll.u32 %s3445_s22, 1  ;;  %v758_v0 = vld [vmem:[%s5766_s1 + $0x78] sm:$0xff]  ;;  %v5772_v1 = vmov 0.0   ;;  %v757_v2 = vld [vmem:[%s5766_s1 + $0x70] sm:$0xff]  ;;  %v756_v3 = vld [vmem:[%s5766_s1 + $0x68] sm:$0xff]  ;;  %vm318_vm0 = vcmask 1046528  }
  0x17   : > { %s243_s15 = sadd.s32 %s3441_s21, %s2677_s12  ;;  %862 = vmatprep.subr.mxu0 %v5772_v1  ;;  %1027 = vmatprep.subr.mxu1 %v5772_v1  ;;  %v755_v4 = vld [vmem:[%s5766_s1 + $0x60] sm:$0xff]  ;;  %v754_v5 = vld [vmem:[%s5766_s1 + $0x58] sm:$0xff]  ;;  %v753_v7 = vld [vmem:[%s5766_s1 + $0x50] sm:$0xff]  ;;  %s3460_s17 = smov 64   ;;  %vm429_vm1 = vcmask 1045504   ;;  %vm678_vm2 = vcmask 523264  }
  0x18   : > { %p244_p12 = scmp.lt.s32.totalorder %s243_s15, 3  ;;  %863 = vmatpush1.msra.mxu0 %v758_v0  ;;  %v790_v6 = vld [vmem:[%s5766_s1 + $0x178] sm:$0xff]  ;;  %v789_v8 = vld [vmem:[%s5766_s1 + $0x170] sm:$0xff]  ;;  %v788_v9 = vld [vmem:[%s5766_s1 + $0x168] sm:$0xff]  ;;  %s2700_s30 = sshll.u32 %s3441_s21, 3  ;;  %vm1459_vm6 = vcmask 1040384  }
  0x19   : > { %864 = vmatprep.subr.mxu0 %v5772_v1  ;;  %1028 = vmatpush1.msra.mxu1 %v790_v6  ;;  %v752_v22 = vld [vmem:[%s5766_s1 + $0x48] sm:$0xff]  ;;  %v751_v38 = vld [vmem:[%s5766_s1 + $0x40] sm:$0xff]  ;;  %v750_v49 = vld [vmem:[%s5766_s1 + $0x38] sm:$0xff]  ;;  %s2701_s8 = sadd.s32 4294967295, %s2700_s30  ;;  %s2722_s10 = sshll.u32 %s3445_s22, 5 }
  0x1a   : > { %s5884_s15 = smov (!%p244_p12, %s243_s15), 3  ;;  %865 = vmatpush1.msra.mxu0 %v757_v2  ;;  %1029 = vmatprep.subr.mxu1 %v5772_v1  ;;  %v749_v55 = vld [vmem:[%s5766_s1 + $0x30] sm:$0xff]  ;;  %v787_v56 = vld [vmem:[%s5766_s1 + $0x160] sm:$0xff]  ;;  %v748_v63 = vld [vmem:[%s5766_s1 + $0x28] sm:$0xff] }
  0x1b   : > { %866 = vmatprep.subr.mxu0 %v5772_v1  ;;  %s3025_s9 = smul.u32 288, %s5884_s15  ;;  %1030 = vmatpush1.msra.mxu1 %v789_v8  ;;  %v786_v0 = vld [vmem:[%s5766_s1 + $0x158] sm:$0xff]  ;;  %s239_s15 = sand.u32 1, %s3433_s19  }
  0x1c   : > { %867 = vmatpush1.msra.mxu0 %v756_v3  ;;  %1031 = vmatprep.subr.mxu1 %v5772_v1  ;;  %s5567_s27 = sshll.u32 %s239_s15, 7  ;;  %s5714_s14 = scalar_lea.sflag [#allocation3], %s239_s15 }
  0x1d   : > { %868 = vmatprep.subr.mxu0 %v5772_v1  ;;  %s3593_s26 = scalar_lea.vmem %s5765_s0, %s3025_s9  ;;  %1032 = vmatpush1.msra.mxu1 %v788_v9  ;;  %s5590_s30 = scalar_lea.vmem [#allocation2], %s5567_s27 }
  0x1e   : > { %869 = vmatpush1.msra.mxu0 %v755_v4  ;;  %v3605_v10 = vld [vmem:[%s3593_s26] sm:$0xff]  ;;  %v3608_v11 = vld [vmem:[%s3593_s26 + $0x8] sm:$0xff]  ;;  %v3611_v12 = vld [vmem:[%s3593_s26 + $0x18] sm:$0xff]  ;;  %1033 = vmatprep.subr.mxu1 %v5772_v1  ;;  %s2593_s12 = sshll.u32 %s5590_s30, 4  ;;  %s3461_s27 = smov [#allocation2]   ;;  %s5705_s12 = int_to_ptr.vmem [resolvable:$true] %s2593_s12 }
  0x1f   : > { %870 = vmatprep.subr.mxu0 %v5772_v1  ;;  %v319_v13 = vrot.slane %v3605_v10, 1  ;;  %v320_v14 = vrot.slane %v3608_v11, 1  ;;  %v3618_v15 = vld [vmem:[%s3593_s26 + $0x20] sm:$0xff]  ;;  %v3621_v16 = vld [vmem:[%s3593_s26 + $0x30] sm:$0xff]  ;;  %v324_v17 = vrot.slane %v3611_v12, 1  ;;  %v3625_v18 = vld [vmem:[%s3593_s26 + $0x38] sm:$0xff]  ;;  %1034 = vmatpush1.msra.mxu1 %v787_v56 }
  0x20   : > { %871 = vmatpush1.msra.mxu0 %v754_v5  ;;  %v325_v19 = vrot.slane %v3618_v15, 1  ;;  %v3629_v20 = vld [vmem:[%s3593_s26 + $0x10] sm:$0x3]  ;;  %v3632_v21 = vld [vmem:[%s3593_s26 + $0x28] sm:$0x3]  ;;  %v329_v26 = vrot.slane %v3621_v16, 1  ;;  %1035 = vmatprep.subr.mxu1 %v5772_v1 }
  0x21   : > { %872 = vmatprep.subr.mxu0 %v5772_v1  ;;  %v321_v23 = vsel %vm318_vm0, %v319_v13, %v320_v14  ;;  %v322_v24 = vrot.slane %v3629_v20, 1  ;;  %v327_v25 = vrot.slane %v3632_v21, 1  ;;  %v3644_v27 = vld [vmem:[%s3593_s26 + $0x40] sm:$0x3]  ;;  %v3651_v30 = vld [vmem:[%s3593_s26 + $0x48] sm:$0xff]  ;;  %v330_v31 = vrot.slane %v3625_v18, 1  ;;  %1036 = vmatpush1.msra.mxu1 %v786_v0 }
  0x22   : > { %873 = vmatpush1.msra.mxu0 %v753_v7  ;;  %v3101_v28 = vpack.i.bf16 %v321_v23, %v3611_v12  ;;  %v3648_v29 = vsel %vm318_vm0, %v324_v17, %v325_v19  ;;  %v3655_v32 = vld [vmem:[%s3593_s26 + $0x50] sm:$0xff]  ;;  %v332_v33 = vrot.slane %v3644_v27, 1  ;;  %v3667_v37 = vld [vmem:[%s3593_s26 + $0x58] sm:$0x3]  ;;  %v334_v42 = vrot.slane %v3651_v30, 1  ;;  %v3687_v45 = vld [vmem:[%s3593_s26 + $0x60] sm:$0xff]  ;;  %1037 = vmatprep.subr.mxu1 %v5772_v1 }
  0x23   : > { %874 = vmatprep.subr.mxu0 %v5772_v1  ;;  %v3111_v34 = vpack.i.bf16 %v3648_v29, %v3621_v16  ;;  %v323_v35 = vsel %vm318_vm0, %v320_v14, %v322_v24  ;;  %v3664_v36 = vsel %vm318_vm0, %v325_v19, %v327_v25  ;;  %v3678_v41 = vsel %vm318_vm0, %v329_v26, %v330_v31  ;;  %v3690_v46 = vld [vmem:[%s3593_s26 + $0x68] sm:$0xff]  ;;  %v3694_v48 = vld [vmem:[%s3593_s26 + $0x70] sm:$0x3]  ;;  %v3721_v58 = vld [vmem:[%s3593_s26 + $0x78] sm:$0xff]  ;;  %s3365_s16 = scalar_lea.vmem %s5705_s12, 2048 }
  0x24   : > { %875 = vmatpush1.msra.mxu0 %v752_v22  ;;  %3102 = vrot.lane.b32.xlu0 %v3101_v28, %s3460_s17  ;;  %v3106_v39 = vpack.i.bf16 %v323_v35, %v3618_v15  ;;  %v3116_v40 = vpack.i.bf16 %v3664_v36, %v3625_v18  ;;  %v335_v43 = vrot.slane %v3655_v32, 1  ;;  %v3684_v44 = vsel %vm318_vm0, %v330_v31, %v332_v33  ;;  %v3724_v59 = vld [vmem:[%s3593_s26 + $0x80] sm:$0xff]  ;;  %v3728_v61 = vld [vmem:[%s3593_s26 + $0x88] sm:$0x3]  ;;  %v3753_v7 = vld [vmem:[%s3593_s26 + $0x90] sm:$0xff]  ;;  %p3366_p13 = scmp.ne.s32.totalorder %s5705_s12, %s3365_s16 }
  0x25   : > { %3112 = vrot.lane.b32.xlu1 %v3111_v34, %s3460_s17  ;;  %876 = vmatprep.subr.mxu0 %v5772_v1  ;;  %v337_v47 = vrot.slane %v3667_v37, 1  ;;  %v3121_v50 = vpack.i.bf16 %v3678_v41, %v3651_v30  ;;  %v3126_v51 = vpack.i.bf16 %v3684_v44, %v3655_v32  ;;  %v339_v53 = vrot.slane %v3687_v45, 1  ;;  %v3756_v8 = vld [vmem:[%s3593_s26 + $0x98] sm:$0xff]  ;;  %v747_v13 = vld [vmem:[%s5766_s1 + $0x20] sm:$0xff]  ;;  %v785_v22 = vld [vmem:[%s5766_s1 + $0x150] sm:$0xff] }
  0x26   : > { %877 = vmatpush1.msra.mxu0 %v751_v38  ;;  %v3707_v52 = vsel %vm318_vm0, %v334_v42, %v335_v43  ;;  %v340_v54 = vrot.slane %v3690_v46, 1  ;;  %v342_v60 = vrot.slane %v3694_v48, 1  ;;  %v344_v4 = vrot.slane %v3721_v58, 1  ;;  %v3764_v14 = vld [vmem:[%s3593_s26 + $0xa0] sm:$0x3]  ;;  %v746_v19 = vld [vmem:[%s5766_s1 + $0x18] sm:$0xff]  ;;  %1038 = vmatpush1.msra.mxu1 %v785_v22  ;;  %p3367_p0 = pnand %p3366_p13, %p3545_p3 }
  0x27   : > { %878 = vmatprep.subr.mxu0 %v5772_v1  ;;  %v3718_v57 = vsel %vm318_vm0, %v335_v43, %v337_v47  ;;  %v3131_v62 = vpack.i.bf16 %v3707_v52, %v3687_v45  ;;  %v345_v5 = vrot.slane %v3724_v59, 1  ;;  %v347_v9 = vrot.slane %v3728_v61, 1  ;;  %v3788_v31 = vld [vmem:[%s3593_s26 + $0xa8] sm:$0xff]  ;;  %v3791_v33 = vld [vmem:[%s3593_s26 + $0xb0] sm:$0xff]  ;;  %v3800_v38 = vld [vmem:[%s3593_s26 + $0xb8] sm:$0x3]  ;;  %1039 = vmatprep.subr.mxu1 %v5772_v1 }
  0x28   : > { %3107 = vrot.lane.b32.xlu0 %v3106_v39, %s3460_s17  ;;  %879 = vmatpush1.msra.mxu0 %v750_v49  ;;  %v3136_v2 = vpack.i.bf16 %v3718_v57, %v3690_v46  ;;  %v3745_v3 = vsel %vm318_vm0, %v339_v53, %v340_v54  ;;  %v3750_v6 = vsel %vm318_vm0, %v340_v54, %v342_v60  ;;  %v349_v25 = vrot.slane %v3753_v7, 1  ;;  %v745_v35 = vld [vmem:[%s5766_s1 + $0x10] sm:$0xff]  ;;  %v784_v42 = vld [vmem:[%s5766_s1 + $0x148] sm:$0xff]  ;;  %v3824_v53 = vld [vmem:[%s3593_s26 + $0xc0] sm:$0xff]  ;;  %p3368_p1 = pneg %p3367_p0 }
  0x29   : > { %3117 = vrot.lane.b32.xlu1 %v3116_v40, %s3460_s17  ;;  %880 = vmatprep.subr.mxu0 %v5772_v1  ;;  %5801 = vst [vmem:[#allocation5_spill] sm:$0xff] %v3750_v6  ;;  %v3141_v17 = vpack.i.bf16 %v3745_v3, %v3721_v58  ;;  %v3146_v23 = vpack.i.bf16 %v3750_v6, %v3724_v59  ;;  %v350_v26 = vrot.slane %v3756_v8, 1  ;;  %v352_v34 = vrot.slane %v3764_v14, 1  ;;  %v744_v40 = vld [vmem:[%s5766_s1 + $0x8] sm:$0xff]  ;;  %v743_v56 = vld [vmem:[%s5766_s1] sm:$0xff] }
  0x2a   : > { %881 = vmatpush1.msra.mxu0 %v749_v55  ;;  %v3780_v24 = vsel %vm318_vm0, %v344_v4, %v345_v5  ;;  %v3785_v28 = vsel %vm318_vm0, %v345_v5, %v347_v9  ;;  %v354_v49 = vrot.slane %v3788_v31, 1  ;;  %5806 = vst [vmem:[#allocation10_spill] sm:$0xff] %v3824_v53  ;;  %v3827_v54 = vld [vmem:[%s3593_s26 + $0xc8] sm:$0xff]  ;;  %v357_v55 = vrot.slane %v3800_v38, 1  ;;  %v3836_v60 = vld [vmem:[%s3593_s26 + $0xd0] sm:$0x3]  ;;  %1040 = vmatpush1.msra.mxu1 %v784_v42 }
  0x2b   : > { %882 = vmatprep.subr.mxu0 %v5772_v1  ;;  %5802 = vst [vmem:[#allocation6_spill] sm:$0xff] %v3780_v24  ;;  %5803 = vst [vmem:[#allocation7_spill] sm:$0xff] %v3785_v28  ;;  %v3151_v39 = vpack.i.bf16 %v3780_v24, %v3753_v7  ;;  %v3156_v43 = vpack.i.bf16 %v3785_v28, %v3756_v8  ;;  %v3816_v47 = vsel %vm318_vm0, %v349_v25, %v350_v26  ;;  %v783_v0 = vld [vmem:[%s5766_s1 + $0x140] sm:$0xff]  ;;  %v3872_v25 = vld [vmem:[%s3593_s26 + $0xe8] sm:$0x3] }
  0x2c   : > { %3122 = vrot.lane.b32.xlu0 %v3121_v50, %s3460_s17  ;;  %883 = vmatpush1.msra.mxu0 %v748_v63  ;;  %5804 = vst [vmem:[#allocation8_spill] sm:$0xff] %v3816_v47  ;;  %v355_v50 = vrot.slane %v3791_v33, 1  ;;  %5807 = vst [vmem:[#allocation11_spill] sm:$0xff] %v3827_v54  ;;  %v774_v63 = vld [vmem:[%s5766_s1 + $0xf8] sm:$0xff]  ;;  %v359_v5 = vrot.slane %v3824_v53, 1  ;;  %v360_v9 = vrot.slane %v3827_v54, 1 }
  0x2d   : > { %3127 = vrot.lane.b32.xlu1 %v3126_v51, %s3460_s17  ;;  %884 = vmatprep.subr.mxu0 %v5772_v1  ;;  %v3821_v51 = vsel %vm318_vm0, %v350_v26, %v352_v34  ;;  %v362_v22 = vrot.slane %v3836_v60, 1  ;;  %v772_v34 = vld [vmem:[%s5766_s1 + $0xe8] sm:$0xff]  ;;  %v4132_v24 = vld [vmem:[%s3593_s26 + $0x118] sm:$0x3] }
  0x2e   : > { %885 = vmatpush1.msra.mxu0 %v747_v13  ;;  %5805 = vst [vmem:[#allocation9_spill] sm:$0xff] %v3821_v51  ;;  %v3852_v4 = vsel %vm318_vm0, %v354_v49, %v355_v50  ;;  %v3857_v13 = vsel %vm318_vm0, %v355_v50, %v357_v55  ;;  %1041 = vmatprep.subr.mxu1 %v5772_v1  ;;  %v367_v50 = vrot.slane %v3872_v25, 1  ;;  %v771_v55 = vld [vmem:[%s5766_s1 + $0xe0] sm:$0xff]  ;;  %v4122_v28 = vld [vmem:[%s3593_s26 + $0x108] sm:$0xff]  ;;  %5818 = vst [vmem:[#allocation21_spill] sm:$0xff] %v4132_v24 }
  0x2f   : > { %886 = vmatprep.subr.mxu0 %v5772_v1  ;;  %5808 = vst [vmem:[#allocation12_spill] sm:$0xff] %v3852_v4  ;;  %5809 = vst [vmem:[#allocation13_spill] sm:$0xff] %v3857_v13  ;;  %1042 = vmatpush1.msra.mxu1 %v783_v0  ;;  %v3171_v26 = vpack.i.bf16 %v3852_v4, %v3824_v53  ;;  %v3893_v49 = vsel %vm318_vm0, %v360_v9, %v362_v22 }
  0x30   : > { %3132 = vrot.lane.b32.xlu0 %v3131_v62, %s3460_s17  ;;  %887 = vmatpush1.msra.mxu0 %v746_v19  ;;  %v3161_v62 = vpack.i.bf16 %v3816_v47, %v3788_v31  ;;  %v3863_v19 = vld [vmem:[%s3593_s26 + $0xe0] sm:$0xff]  ;;  %5813 = vst [vmem:[#allocation17_spill] sm:$0xff] %v3893_v49  ;;  %v478_v47 = vrot.slane %v3872_v25, 2 }
  0x31   : > { %3137 = vrot.lane.b32.xlu1 %v3136_v2, %s3460_s17  ;;  %888 = vmatprep.subr.mxu0 %v5772_v1  ;;  %v3166_v2 = vpack.i.bf16 %v3821_v51, %v3791_v33  ;;  %5811 = vst [vmem:[#allocation15_spill] sm:$0xff] %v3863_v19  ;;  %v3186_v0 = vpack.i.bf16 %v3893_v49, %v3863_v19  ;;  %v804_v49 = vld [vmem:[%s5766_s1 + $0x1e8] sm:$0xff] }
  0x32   : > { %889 = vmatpush1.msra.mxu0 %v745_v35  ;;  %v782_v35 = vld [vmem:[%s5766_s1 + $0x138] sm:$0xff]  ;;  %1043 = vmatprep.subr.mxu1 %v5772_v1 }
  0x33   : > { %890 = vmatprep.subr.mxu0 %v5772_v1  ;;  %1044 = vmatpush1.msra.mxu1 %v782_v35  ;;  %v780_v35 = vld [vmem:[%s5766_s1 + $0x128] sm:$0xff] }
  0x34   : > { %3142 = vrot.lane.b32.xlu0 %v3141_v17, %s3460_s17  ;;  %891 = vmatpush1.msra.mxu0 %v744_v40  ;;  %v3860_v17 = vld [vmem:[%s3593_s26 + $0xd8] sm:$0xff]  ;;  %v3888_v40 = vsel %vm318_vm0, %v359_v5, %v360_v9 }
  0x35   : > { %3147 = vrot.lane.b32.xlu1 %v3146_v23, %s3460_s17  ;;  %892 = vmatprep.subr.mxu0 %v5772_v1  ;;  %5810 = vst [vmem:[#allocation14_spill] sm:$0xff] %v3860_v17  ;;  %v773_v23 = vld [vmem:[%s5766_s1 + $0xf0] sm:$0xff]  ;;  %5812 = vst [vmem:[#allocation16_spill] sm:$0xff] %v3888_v40  ;;  %v364_v42 = vrot.slane %v3860_v17, 1  ;;  %v3921_v9 = vld [vmem:[%s3593_s26 + $0xf8] sm:$0xff] }
  0x36   : > { %893 = vmatpush1.msra.mxu0 %v743_v56  ;;  %v3181_v56 = vpack.i.bf16 %v3888_v40, %v3860_v17  ;;  %1045 = vmatprep.subr.mxu1 %v5772_v1  ;;  %v470_v40 = vrot.slane %v3824_v53, 2  ;;  %v659_v53 = vrot.slane %v4132_v24, 1  ;;  %v798_v24 = vld [vmem:[%s5766_s1 + $0x1b8] sm:$0xff] }
  0x37   : > { %894 = vmatprep.subr.mxu0 %v5772_v1 }
  0x38   : > { %3152 = vrot.lane.b32.xlu0 %v3151_v39, %s3460_s17  ;;  %895 = vmatpush2.msra.mxu0 %v774_v63  ;;  %v3176_v39 = vpack.i.bf16 %v3857_v13, %v3827_v54  ;;  %v781_v63 = vld [vmem:[%s5766_s1 + $0x130] sm:$0xff] }
  0x39   : > { %3157 = vrot.lane.b32.xlu1 %v3156_v43, %s3460_s17  ;;  %896 = vmatprep.subr.mxu0 %v5772_v1  ;;  %v365_v43 = vrot.slane %v3863_v19, 1 }
  0x3a   : > { %897 = vmatpush2.msra.mxu0 %v773_v23  ;;  %v769_v23 = vld [vmem:[%s5766_s1 + $0xd0] sm:$0xff]  ;;  %1046 = vmatpush1.msra.mxu1 %v781_v63  ;;  %v440_v63 = vrot.slane %v3621_v16, 2 }
  0x3b   : > { %898 = vmatprep.subr.mxu0 %v5772_v1  ;;  %v3918_v5 = vsel %vm318_vm0, %v364_v42, %v365_v43  ;;  %v3924_v22 = vsel %vm318_vm0, %v365_v43, %v367_v50  ;;  %v435_v42 = vrot.slane %v3611_v12, 2  ;;  %v436_v43 = vrot.slane %v3618_v15, 2  ;;  %1047 = vmatprep.subr.mxu1 %v5772_v1 }
  0x3c   : > { %3162 = vrot.lane.b32.xlu0 %v3161_v62, %s3460_s17  ;;  %899 = vmatpush2.msra.mxu0 %v772_v34  ;;  %v770_v62 = vld [vmem:[%s5766_s1 + $0xd8] sm:$0xff]  ;;  %5815 = vst [vmem:[#allocation19_spill] sm:$0xff] %v3918_v5  ;;  %5816 = vst [vmem:[#allocation20_spill] sm:$0xff] %v3924_v22  ;;  %v768_v34 = vld [vmem:[%s5766_s1 + $0xc8] sm:$0xff]  ;;  %v438_v50 = vrot.slane %v3632_v21, 2 }
  0x3d   : > { %3167 = vrot.lane.b32.xlu1 %v3166_v2, %s3460_s17  ;;  %900 = vmatprep.subr.mxu0 %v5772_v1  ;;  %v3915_v2 = vld [vmem:[%s3593_s26 + $0xf0] sm:$0xff]  ;;  %v779_v21 = vld [vmem:[%s5766_s1 + $0x120] sm:$0xff] }
  0x3e   : > { %5814 = vst [vmem:[#allocation18_spill] sm:$0xff] %v3915_v2  ;;  %901 = vmatpush2.msra.mxu0 %v771_v55  ;;  %v767_v55 = vld [vmem:[%s5766_s1 + $0xc0] sm:$0xff]  ;;  %1048 = vmatpush1.msra.mxu1 %v780_v35  ;;  %v764_v35 = vld [vmem:[%s5766_s1 + $0xa8] sm:$0xff]  ;;  %v563_v4 = vrot.slane %v3915_v2, 1 }
  0x3f   : > { %902 = vmatprep.subr.mxu0 %v5772_v1  ;;  %1049 = vmatprep.subr.mxu1 %v5772_v1 }
  0x40   : > { %3172 = vrot.lane.b32.xlu0 %v3171_v26, %s3460_s17  ;;  %903 = vmatpush2.msra.mxu0 %v770_v62  ;;  %v3191_v26 = vpack.i.bf16 %v3918_v5, %v3915_v2  ;;  %v3962_v62 = vsel %vm429_vm1, %v435_v42, %v436_v43  ;;  %v445_v42 = vrot.slane %v3651_v30, 2  ;;  %v5817_v5 = vmov 0.0  }
  0x41   : > { %3177 = vrot.lane.b32.xlu1 %v3176_v39, %s3460_s17  ;;  %904 = vmatprep.subr.mxu0 %v5772_v1  ;;  %v3196_v39 = vpack.i.bf16 %v3924_v22, %v3921_v9  ;;  %v759_v22 = vld [vmem:[%s5766_s1 + $0x80] sm:$0xff] }
  0x42   : > { %905 = vmatpush2.msra.mxu0 %v769_v23  ;;  %v3967_v23 = vsel %vm429_vm1, %v436_v43, %v438_v50  ;;  %1050 = vmatpush1.msra.mxu1 %v779_v21  ;;  %v446_v43 = vrot.slane %v3655_v32, 2  ;;  %v762_v21 = vld [vmem:[%s5766_s1 + $0x98] sm:$0xff] }
  0x43   : > { %906 = vmatprep.subr.mxu0 %v5772_v1  ;;  %1051 = vmatprep.subr.mxu1 %v5772_v1 }
  0x44   : > { %3182 = vrot.lane.b32.xlu0 %v3181_v56, %s3460_s17  ;;  %907 = vmatpush2.msra.mxu0 %v768_v34  ;;  %v766_v56 = vld [vmem:[%s5766_s1 + $0xb8] sm:$0xff]  ;;  %v765_v34 = vld [vmem:[%s5766_s1 + $0xb0] sm:$0xff] }
  0x45   : > { %3187 = vrot.lane.b32.xlu1 %v3186_v0, %s3460_s17  ;;  %908 = vmatprep.subr.mxu0 %v5772_v1  ;;  %v441_v0 = vrot.slane %v3625_v18, 2 }
  0x46   : > { %909 = vmatpush2.msra.mxu0 %v767_v55  ;;  %v448_v55 = vrot.slane %v3667_v37, 2  ;;  %v777_v37 = vld [vmem:[%s5766_s1 + $0x110] sm:$0xff] }
  0x47   : > { %910 = vmatprep.subr.mxu0 %v5772_v1 }
  0x48   : > { %3192 = vrot.lane.b32.xlu0 %v3191_v26, %s3460_s17  ;;  %v443_v26 = vrot.slane %v3644_v27, 2  ;;  %911 = vmatpush2.msra.mxu0 %v766_v56  ;;  %v778_v27 = vld [vmem:[%s5766_s1 + $0x118] sm:$0xff]  ;;  %v763_v56 = vld [vmem:[%s5766_s1 + $0xa0] sm:$0xff] }
  0x49   : > { %3197 = vrot.lane.b32.xlu1 %v3196_v39, %s3460_s17  ;;  %912 = vmatprep.subr.mxu0 %v5772_v1  ;;  %v3987_v39 = vsel %vm429_vm1, %v440_v63, %v441_v0  ;;  %v4012_v63 = vsel %vm429_vm1, %v445_v42, %v446_v43  ;;  %v760_v42 = vld [vmem:[%s5766_s1 + $0x88] sm:$0xff] }
  0x4a   : > { %913 = vmatpush2.msra.mxu0 %v765_v34  ;;  %v3992_v50 = vsel %vm429_vm1, %v441_v0, %v443_v26  ;;  %1052 = vmatpush1.msra.mxu1 %v778_v27  ;;  %v450_v0 = vrot.slane %v3687_v45, 2  ;;  %v451_v26 = vrot.slane %v3690_v46, 2  ;;  %v4017_v34 = vsel %vm429_vm1, %v446_v43, %v448_v55  ;;  %v761_v27 = vld [vmem:[%s5766_s1 + $0x90] sm:$0xff] }
  0x4b   : > { %914 = vmatprep.subr.mxu0 %v5772_v1  ;;  %1053 = vmatprep.subr.mxu1 %v5772_v1  ;;  %v455_v55 = vrot.slane %v3721_v58, 2 }
  0x4c   : > { %593 = vrot.lane.b32.xlu0 %v3962_v62, %s3460_s17  ;;  %915 = vmatpush2.msra.mxu0 %v764_v35  ;;  %v453_v35 = vrot.slane %v3694_v48, 2  ;;  %v776_v48 = vld [vmem:[%s5766_s1 + $0x108] sm:$0xff]  ;;  %v4037_v43 = vsel %vm429_vm1, %v450_v0, %v451_v26  ;;  %v4053_v0 = vld [vmem:[%s5766_s1 + $0x238] sm:$0xff] }
  0x4d   : > { %595 = vrot.lane.b32.xlu1 %v3967_v23, %s3460_s17  ;;  %916 = vmatprep.subr.mxu0 %v5772_v1 }
  0x4e   : > { %917 = vmatpush2.msra.mxu0 %v763_v56  ;;  %1054 = vmatpush1.msra.mxu1 %v777_v37  ;;  %v456_v56 = vrot.slane %v3724_v59, 2  ;;  %v458_v37 = vrot.slane %v3728_v61, 2  ;;  %v775_v61 = vld [vmem:[%s5766_s1 + $0x100] sm:$0xff] }
  0x4f   : > { %918 = vmatprep.subr.mxu0 %v5772_v1  ;;  %1055 = vmatprep.subr.mxu1 %v5772_v1 }
  0x50   : > { %597 = vrot.lane.b32.xlu0 %v3987_v39, %s3460_s17  ;;  %919 = vmatpush2.msra.mxu0 %v762_v21  ;;  %v4042_v21 = vsel %vm429_vm1, %v451_v26, %v453_v35  ;;  %v4064_v26 = vsel %vm429_vm1, %v455_v55, %v456_v56  ;;  %v460_v35 = vrot.slane %v3753_v7, 2  ;;  %v806_v55 = vld [vmem:[%s5766_s1 + $0x1f8] sm:$0xff] }
  0x51   : > { %599 = vrot.lane.b32.xlu1 %v3992_v50, %s3460_s17  ;;  %920 = vmatprep.subr.mxu0 %v5772_v1 }
  0x52   : > { %921 = vmatpush2.msra.mxu0 %v761_v27  ;;  %1056 = vmatpush1.msra.mxu1 %v776_v48  ;;  %v461_v27 = vrot.slane %v3756_v8, 2  ;;  %v463_v48 = vrot.slane %v3764_v14, 2 }
  0x53   : > { %922 = vmatprep.subr.mxu0 %v5772_v1  ;;  %1057 = vmatprep.subr.mxu1 %v5772_v1 }
  0x54   : > { %601 = vrot.lane.b32.xlu0 %v4012_v63, %s3460_s17  ;;  %923 = vmatpush2.msra.mxu0 %v760_v42  ;;  %v4069_v42 = vsel %vm429_vm1, %v456_v56, %v458_v37  ;;  %v4086_v14 = vsel %vm429_vm1, %v460_v35, %v461_v27  ;;  %v465_v56 = vrot.slane %v3788_v31, 2  ;;  %v466_v37 = vrot.slane %v3791_v33, 2  ;;  %v284_v35 = vld [vmem:[%s3593_s26 + $0x100] sm:$0x3] }
  0x55   : > { %603 = vrot.lane.b32.xlu1 %v4017_v34, %s3460_s17  ;;  %924 = vmatprep.subr.mxu0 %v5772_v1  ;;  %v591_v6 = vrot.slane %v284_v35, 2 }
  0x56   : > { %925 = vmatpush2.msra.mxu0 %v759_v22  ;;  %1058 = vmatpush1.msra.mxu1 %v775_v61  ;;  %v805_v22 = vld [vmem:[%s5766_s1 + $0x1f0] sm:$0xff]  ;;  %v4091_v61 = vsel %vm429_vm1, %v461_v27, %v463_v48  ;;  %v471_v27 = vrot.slane %v3827_v54, 2  ;;  %v473_v48 = vrot.slane %v3836_v60, 2  ;;  %v4113_v13 = vsel %vm429_vm1, %v465_v56, %v466_v37  ;;  %v802_v56 = vld [vmem:[%s5766_s1 + $0x1d8] sm:$0xff] }
  0x57   : > { %2939 = vmatprep.subr.mxu0 %v4053_v0  ;;  %1059 = vmatprep.subr.mxu1 %v5772_v1  ;;  %v468_v1 = vrot.slane %v3800_v38, 2  ;;  %v475_v38 = vrot.slane %v3860_v17, 2  ;;  %v564_v60 = vrot.slane %v3921_v9, 1  ;;  %v4125_v17 = vld [vmem:[%s3593_s26 + $0x110] sm:$0xff] }
  0x58   : > { %605 = vrot.lane.b32.xlu0 %v4037_v43, %s3460_s17  ;;  %1060 = vmatpush2.msra.mxu1 %v806_v55  ;;  %v476_v55 = vrot.slane %v3863_v19, 2  ;;  %v566_v19 = vrot.slane %v284_v35, 1  ;;  %v4140_v25 = vsel %vm429_vm1, %v471_v27, %v473_v48  ;;  %v656_v48 = vrot.slane %v4122_v28, 1 }
  0x59   : > { %607 = vrot.lane.b32.xlu1 %v4042_v21, %s3460_s17  ;;  %1061 = vmatprep.subr.mxu1 %v5817_v5  ;;  %v4118_v51 = vsel %vm429_vm1, %v466_v37, %v468_v1  ;;  %v4137_v1 = vsel %vm429_vm1, %v470_v40, %v471_v27  ;;  %v588_v37 = vrot.slane %v3915_v2, 2  ;;  %v4153_v40 = vsel %vm318_vm0, %v563_v4, %v564_v60  ;;  %v800_v4 = vld [vmem:[%s5766_s1 + $0x1c8] sm:$0xff] }
  0x5a   : > { %1062 = vmatpush2.msra.mxu1 %v805_v22  ;;  %v803_v22 = vld [vmem:[%s5766_s1 + $0x1e0] sm:$0xff]  ;;  %v589_v27 = vrot.slane %v3921_v9, 2  ;;  %v4159_v2 = vsel %vm429_vm1, %v476_v55, %v478_v47  ;;  %v4162_v54 = vsel %vm318_vm0, %v564_v60, %v566_v19 }
  0x5b   : > { %1063 = vmatprep.subr.mxu1 %v5817_v5  ;;  %v799_v19 = vld [vmem:[%s5766_s1 + $0x1c0] sm:$0xff]  ;;  %v3206_v35 = vpack.i.bf16 %v4159_v2, %v4162_v54 }
  0x5c   : > { %609 = vrot.lane.b32.xlu0 %v4064_v26, %s3460_s17  ;;  %1064 = vmatpush2.msra.mxu1 %v804_v49  ;;  %v4143_v49 = vsel %vm429_vm1, %v475_v38, %v476_v55  ;;  %v657_v38 = vrot.slane %v4125_v17, 1  ;;  %v4182_v55 = vsel %vm429_vm1, %v588_v37, %v589_v27 }
  0x5d   : > { %611 = vrot.lane.b32.xlu1 %v4069_v42, %s3460_s17  ;;  %1065 = vmatprep.subr.mxu1 %v5817_v5  ;;  %v3201_v47 = vpack.i.bf16 %v4143_v49, %v4153_v40 }
  0x5e   : > { %1066 = vmatpush2.msra.mxu1 %v803_v22  ;;  %v801_v22 = vld [vmem:[%s5766_s1 + $0x1d0] sm:$0xff]  ;;  %v658_v60 = vsel %vm318_vm0, %v656_v48, %v657_v38  ;;  %v795_v48 = vld [vmem:[%s5766_s1 + $0x1a0] sm:$0xff] }
  0x5f   : > { %1067 = vmatprep.subr.mxu1 %v5817_v5  ;;  %v3211_v37 = vpack.i.bf16 %v4182_v55, %v658_v60 }
  0x60   : > { %613 = vrot.lane.b32.xlu0 %v4086_v14, %s3460_s17  ;;  %1068 = vmatpush2.msra.mxu1 %v802_v56  ;;  %v4186_v56 = vsel %vm429_vm1, %v589_v27, %v591_v6  ;;  %v797_v6 = vld [vmem:[%s5766_s1 + $0x1b0] sm:$0xff]  ;;  %v796_v27 = vld [vmem:[%s5766_s1 + $0x1a8] sm:$0xff] }
  0x61   : > { %615 = vrot.lane.b32.xlu1 %v4091_v61, %s3460_s17  ;;  %1069 = vmatprep.subr.mxu1 %v5817_v5  ;;  %5819 = vst [vmem:[#allocation22_spill] sm:$0xff] %v4186_v56 }
  0x62   : > { %1070 = vmatpush2.msra.mxu1 %v801_v22  ;;  %v660_v22 = vsel %vm318_vm0, %v657_v38, %v659_v53  ;;  %v793_v38 = vld [vmem:[%s5766_s1 + $0x190] sm:$0xff] }
  0x63   : > { %1071 = vmatprep.subr.mxu1 %v5817_v5  ;;  %v3216_v53 = vpack.i.bf16 %v4186_v56, %v660_v22 }
  0x64   : > { %617 = vrot.lane.b32.xlu0 %v4113_v13, %s3460_s17  ;;  %1072 = vmatpush2.msra.mxu1 %v800_v4  ;;  %v792_v4 = vld [vmem:[%s5766_s1 + $0x188] sm:$0xff] }
  0x65   : > { %619 = vrot.lane.b32.xlu1 %v4118_v51, %s3460_s17  ;;  %1073 = vmatprep.subr.mxu1 %v5817_v5 }
  0x66   : > { %1074 = vmatpush2.msra.mxu1 %v799_v19  ;;  %v430_v19 = vrot.slane %v3605_v10, 2 }
  0x67   : > { %1075 = vmatprep.subr.mxu1 %v5817_v5 }
  0x68   : > { %621 = vrot.lane.b32.xlu0 %v4137_v1, %s3460_s17  ;;  %1076 = vmatpush2.msra.mxu1 %v798_v24  ;;  %v794_v24 = vld [vmem:[%s5766_s1 + $0x198] sm:$0xff] }
  0x69   : > { %623 = vrot.lane.b32.xlu1 %v4140_v25, %s3460_s17  ;;  %1077 = vmatprep.subr.mxu1 %v5817_v5 }
  0x6a   : > { %1078 = vmatpush2.msra.mxu1 %v797_v6 }
  0x6b   : > { %1079 = vmatprep.subr.mxu1 %v5817_v5 }
  0x6c   : > { %3202 = vrot.lane.b32.xlu0 %v3201_v47, %s3460_s17  ;;  %1080 = vmatpush2.msra.mxu1 %v796_v27  ;;  %v791_v47 = vld [vmem:[%s5766_s1 + $0x180] sm:$0xff] }
  0x6d   : > { %3207 = vrot.lane.b32.xlu1 %v3206_v35, %s3460_s17  ;;  %1081 = vmatprep.subr.mxu1 %v5817_v5  ;;  %v431_v35 = vrot.slane %v3608_v11, 2 }
  0x6e   : > { %1082 = vmatpush2.msra.mxu1 %v795_v48 }
  0x6f   : > { %1083 = vmatprep.subr.mxu1 %v5817_v5  ;;  %v432_v22 = vsel %vm429_vm1, %v430_v19, %v431_v35 }
  0x70   : > { %3212 = vrot.lane.b32.xlu0 %v3211_v37, %s3460_s17  ;;  %1084 = vmatpush2.msra.mxu1 %v794_v24  ;;  %v433_v37 = vrot.slane %v3629_v20, 2 }
  0x71   : > { %3217 = vrot.lane.b32.xlu1 %v3216_v53, %s3460_s17  ;;  %1085 = vmatprep.subr.mxu1 %v5817_v5 }
  0x72   : > { %1086 = vmatpush2.msra.mxu1 %v793_v38 }
  0x73   : > { %1087 = vmatprep.subr.mxu1 %v5817_v5 }
  0x74   : > { %1088 = vmatpush2.msra.mxu1 %v792_v4  ;;  %v434_v4 = vsel %vm429_vm1, %v431_v35, %v433_v37 }
  0x75   : > { %1089 = vmatprep.subr.mxu1 %v5817_v5 }
  0x76   : > { %1090 = vmatpush2.msra.mxu1 %v791_v47  ;;  %v813_v47 = vld [vmem:[%s5766_s1 + $0x230] sm:$0xff] }
  0x96   : > { %v3103_v60 = vpop.permute.xlu0 %3102 }
  0x97   : > { %v3105_v6 = vunpack.i.h.bf16 %v3103_v60  ;;  %v3104_v53 = vunpack.i.l.bf16 %v3103_v60  ;;  %v3113_v27 = vpop.permute.xlu1 %3112 }
  0x98   : > { %v3114_v48 = vunpack.i.l.bf16 %v3113_v27  ;;  %v3115_v60 = vunpack.i.h.bf16 %v3113_v27 }
  0x99   : > { %v699_v24 = vsel %vm678_vm2, %v432_v22, %v3104_v53  ;;  %v679_v5 = vsel %vm678_vm2, %v3605_v10, %v3105_v6  ;;  %v812_v22 = vld [vmem:[%s5766_s1 + $0x228] sm:$0xff] }
  0x9a   : > { %v3108_v38 = vpop.permute.xlu0 %3107  ;;  %926 = vmatprep.mubr.f32.mxu0 %v699_v24  ;;  %v701_v37 = vsel %vm678_vm2, %v3962_v62, %v3114_v48  ;;  %v810_v62 = vld [vmem:[%s5766_s1 + $0x218] sm:$0xff] }
  0x9b   : > { %v3110_v19 = vunpack.i.h.bf16 %v3108_v38  ;;  %v3109_v56 = vunpack.i.l.bf16 %v3108_v38  ;;  %927 = vmatmul.mubr.f32.vlgmr.msra.gmra.mxu0 %v679_v5  ;;  %v3118_v20 = vpop.permute.xlu1 %3117 }
  0x9c   : > { %2940 = vmatpush3.msra.mxu0 %v4053_v0  ;;  %v3119_v10 = vunpack.i.l.bf16 %v3118_v20  ;;  %v811_v0 = vld [vmem:[%s5766_s1 + $0x220] sm:$0xff]  ;;  %v3120_v5 = vunpack.i.h.bf16 %v3118_v20 }
  0x9d   : > { %v700_v6 = vsel %vm678_vm2, %v434_v4, %v3109_v56  ;;  %v680_v35 = vsel %vm678_vm2, %v3608_v11, %v3110_v19  ;;  %2941 = vmatprep.subr.mxu0 %v813_v47  ;;  %v681_v11 = vsel %vm678_vm2, %v3611_v12, %v3115_v60  ;;  %v809_v12 = vld [vmem:[%s5766_s1 + $0x210] sm:$0xff] }
  0x9e   : > { %v3123_v53 = vpop.permute.xlu0 %3122  ;;  %931 = vmatprep.mubr.f32.mxu0 %v700_v6  ;;  %2942 = vmatpush3.msra.mxu0 %v813_v47  ;;  %v702_v48 = vsel %vm678_vm2, %v3967_v23, %v3119_v10  ;;  %v682_v19 = vsel %vm678_vm2, %v3618_v15, %v3120_v5 }
  0x9f   : > { %v3125_v27 = vunpack.i.h.bf16 %v3123_v53  ;;  %932 = vmatmul.mubr.f32.gmra.mxu0 %v680_v35  ;;  %v3128_v24 = vpop.permute.xlu1 %3127  ;;  %2943 = vmatprep.subr.mxu0 %v812_v22  ;;  %v3124_v56 = vunpack.i.l.bf16 %v3123_v53 }
  0xa0   : > { %936 = vmatprep.mubr.f32.mxu0 %v701_v37  ;;  %2944 = vmatpush3.msra.mxu0 %v812_v22  ;;  %v3129_v23 = vunpack.i.l.bf16 %v3128_v24  ;;  %v807_v22 = vld [vmem:[%s5766_s1 + $0x200] sm:$0xff]  ;;  %v3130_v15 = vunpack.i.h.bf16 %v3128_v24 }
  0xa1   : > { %v683_v38 = vsel %vm678_vm2, %v3621_v16, %v3125_v27  ;;  %2945 = vmatprep.subr.mxu0 %v811_v0  ;;  %v808_v16 = vld [vmem:[%s5766_s1 + $0x208] sm:$0xff]  ;;  %v703_v20 = vsel %vm678_vm2, %v3987_v39, %v3124_v56 }
  0xa2   : > { %v3133_v4 = vpop.permute.xlu0 %3132  ;;  %1091 = vmatprep.mubr.f32.mxu1 %v683_v38  ;;  %2946 = vmatpush3.msra.mxu0 %v811_v0  ;;  %v704_v35 = vsel %vm678_vm2, %v3992_v50, %v3129_v23  ;;  %v684_v27 = vsel %vm678_vm2, %v3625_v18, %v3130_v15 }
  0xa3   : > { %937 = vmatmul.mubr.f32.gmra.mxu0 %v681_v11  ;;  %v3138_v47 = vpop.permute.xlu1 %3137  ;;  %2947 = vmatprep.subr.mxu0 %v810_v62  ;;  %v3134_v6 = vunpack.i.l.bf16 %v3133_v4  ;;  %v3135_v0 = vunpack.i.h.bf16 %v3133_v4 }
  0xa4   : > { %941 = vmatprep.mubr.f32.mxu0 %v702_v48  ;;  %2948 = vmatpush3.msra.mxu0 %v810_v62  ;;  %v3139_v5 = vunpack.i.l.bf16 %v3138_v47  ;;  %v3140_v56 = vunpack.i.h.bf16 %v3138_v47 }
  0xa5   : > { %2949 = vmatprep.subr.mxu0 %v809_v12  ;;  %v705_v24 = vsel %vm678_vm2, %v4012_v63, %v3134_v6  ;;  %v685_v48 = vsel %vm678_vm2, %v3651_v30, %v3135_v0 }
  0xa6   : > { %v3143_v60 = vpop.permute.xlu0 %3142  ;;  %2950 = vmatpush3.msra.mxu0 %v809_v12  ;;  %v706_v4 = vsel %vm678_vm2, %v4017_v34, %v3139_v5 }
  0xa7   : > { %942 = vmatmul.mubr.f32.gmra.mxu0 %v682_v19  ;;  %v3148_v10 = vpop.permute.xlu1 %3147  ;;  %2951 = vmatprep.subr.mxu0 %v808_v16  ;;  %v3145_v19 = vunpack.i.h.bf16 %v3143_v60 }
  0xa8   : > { %946 = vmatprep.mubr.f32.mxu0 %v703_v20  ;;  %2952 = vmatpush3.msra.mxu0 %v808_v16  ;;  %v686_v16 = vsel %vm678_vm2, %v3655_v32, %v3140_v56  ;;  %v3149_v23 = vunpack.i.l.bf16 %v3148_v10 }
  0xa9   : > { %2953 = vmatprep.subr.mxu0 %v807_v22  ;;  %v687_v15 = vsel %vm678_vm2, %v3687_v45, %v3145_v19 }
  0xaa   : > { %v3153_v37 = vpop.permute.xlu0 %3152  ;;  %2954 = vmatpush3.msra.mxu0 %v807_v22  ;;  %v3150_v22 = vunpack.i.h.bf16 %v3148_v10 }
  0xab   : > { %947 = vmatmul.mubr.f32.gmra.mxu0 %v683_v38  ;;  %v3158_v53 = vpop.permute.xlu1 %3157  ;;  %v3144_v38 = vunpack.i.l.bf16 %v3143_v60  ;;  %v3154_v6 = vunpack.i.l.bf16 %v3153_v37  ;;  %v708_v60 = vsel %vm678_vm2, %v4042_v21, %v3149_v23  ;;  %v3155_v0 = vunpack.i.h.bf16 %v3153_v37 }
  0xac   : > { %951 = vmatprep.mubr.f32.mxu0 %v704_v35  ;;  %v688_v5 = vsel %vm678_vm2, %v3690_v46, %v3150_v22 }
  0xad   : > { %v707_v47 = vsel %vm678_vm2, %v4037_v43, %v3144_v38  ;;  %v709_v10 = vsel %vm678_vm2, %v4064_v26, %v3154_v6  ;;  %v689_v37 = vsel %vm678_vm2, %v3721_v58, %v3155_v0 }
  0xae   : > { %v3163_v11 = vpop.permute.xlu0 %3162 }
  0xaf   : > { %952 = vmatmul.mubr.f32.gmra.mxu0 %v684_v27  ;;  %v4279_v62 = vpop.permute.xlu1 %3167  ;;  %v3164_v19 = vunpack.i.l.bf16 %v3163_v11  ;;  %v3165_v22 = vunpack.i.h.bf16 %v3163_v11 }
  0xb0   : > { %956 = vmatprep.mubr.f32.mxu0 %v705_v24  ;;  %v3159_v24 = vunpack.i.l.bf16 %v3158_v53  ;;  %v3170_v6 = vunpack.i.h.bf16 %v4279_v62 }
  0xb1   : > { %v691_v11 = vsel %vm678_vm2, %v3753_v7, %v3165_v22 }
  0xb2   : > { %v4285_v12 = vpop.permute.xlu0 %3172  ;;  %v710_v23 = vsel %vm678_vm2, %v4069_v42, %v3159_v24 }
  0xb3   : > { %957 = vmatmul.mubr.f32.gmra.mxu0 %v685_v48  ;;  %v4287_v18 = vpop.permute.xlu1 %3177  ;;  %v3175_v0 = vunpack.i.h.bf16 %v4285_v12 }
  0xb4   : > { %961 = vmatprep.mubr.f32.mxu0 %v706_v4  ;;  %v3160_v4 = vunpack.i.h.bf16 %v3158_v53  ;;  %v3169_v53 = vunpack.i.l.bf16 %v4279_v62  ;;  %v692_v62 = vsel %vm678_vm2, %v3756_v8, %v3170_v6  ;;  %v3179_v7 = vunpack.i.l.bf16 %v4287_v18 }
  0xb6   : > { %v4293_v20 = vpop.permute.xlu0 %3182 }
  0xb7   : > { %962 = vmatmul.mubr.f32.gmra.mxu0 %v686_v16  ;;  %v4295_v30 = vpop.permute.xlu1 %3187  ;;  %v3184_v8 = vunpack.i.l.bf16 %v4293_v20 }
  0xb8   : > { %966 = vmatprep.mubr.f32.mxu0 %v707_v47 }
  0xba   : > { %v4301_v35 = vpop.permute.xlu0 %3192 }
  0xbb   : > { %967 = vmatmul.mubr.f32.gmra.mxu0 %v687_v15  ;;  %v4303_v32 = vpop.permute.xlu1 %3197 }
  0xbc   : > { %971 = vmatprep.mubr.f32.mxu0 %v708_v60  ;;  %v3200_v6 = vunpack.i.h.bf16 %v4303_v32 }
  0xbe   : > { %v594_v56 = vpop.permute.xlu0 %593 }
  0xbf   : > { %972 = vmatmul.mubr.f32.gmra.mxu0 %v688_v5  ;;  %v719_v45 = vsel %vm678_vm2, %v3648_v29, %v594_v56  ;;  %v596_v38 = vpop.permute.xlu1 %595  ;;  %v690_v29 = vsel %vm678_vm2, %v3724_v59, %v3160_v4  ;;  %v3174_v59 = vunpack.i.l.bf16 %v4285_v12  ;;  %v693_v12 = vsel %vm678_vm2, %v3788_v31, %v3175_v0  ;;  %v5826_v0 = vld [vmem:[#allocation15_spill] sm:$0xff] }
  0xc0   : > { %1092 = vmatmul.mubr.f32.vlgmr.msra.gmra.mxu1 %v719_v45  ;;  %976 = vmatprep.mubr.f32.mxu0 %v709_v10  ;;  %v720_v46 = vsel %vm678_vm2, %v3664_v36, %v596_v38  ;;  %v711_v36 = vsel %vm678_vm2, %v4086_v14, %v3164_v19  ;;  %v3180_v10 = vunpack.i.h.bf16 %v4287_v18  ;;  %v3185_v45 = vunpack.i.h.bf16 %v4293_v20  ;;  %v5820_v20 = vld [vmem:[#allocation10_spill] sm:$0xff] }
  0xc1   : > { %1096 = vmatprep.mubr.f32.mxu1 %v684_v27  ;;  %v3189_v31 = vunpack.i.l.bf16 %v4295_v30  ;;  %v3190_v4 = vunpack.i.h.bf16 %v4295_v30  ;;  %v5822_v30 = vld [vmem:[#allocation11_spill] sm:$0xff] }
  0xc2   : > { %v598_v47 = vpop.permute.xlu0 %597  ;;  %v694_v18 = vsel %vm678_vm2, %v3791_v33, %v3180_v10  ;;  %v695_v19 = vsel %vm678_vm2, %v5820_v20, %v3185_v45  ;;  %v3194_v33 = vunpack.i.l.bf16 %v4301_v35  ;;  %v5831_v45 = vld [vmem:[#allocation16_spill] sm:$0xff] }
  0xc3   : > { %977 = vmatmul.mubr.f32.gmra.mxu0 %v689_v37  ;;  %v721_v58 = vsel %vm678_vm2, %v3678_v41, %v598_v47  ;;  %v600_v27 = vpop.permute.xlu1 %599  ;;  %v712_v41 = vsel %vm678_vm2, %v4091_v61, %v3169_v53  ;;  %v3195_v47 = vunpack.i.h.bf16 %v4301_v35  ;;  %v696_v22 = vsel %vm678_vm2, %v5822_v30, %v3190_v4  ;;  %v5824_v35 = vld [vmem:[#allocation14_spill] sm:$0xff] }
  0xc4   : > { %1097 = vmatmul.mubr.f32.gmra.mxu1 %v720_v46  ;;  %981 = vmatprep.mubr.f32.mxu0 %v710_v23  ;;  %v5821_v46 = vld [vmem:[#allocation5_spill] sm:$0xff]  ;;  %v3199_v53 = vunpack.i.l.bf16 %v4303_v32  ;;  %v5827_v32 = vld [vmem:[#allocation8_spill] sm:$0xff] }
  0xc5   : > { %1101 = vmatprep.mubr.f32.mxu1 %v685_v48  ;;  %v722_v48 = vsel %vm678_vm2, %v3684_v44, %v600_v27  ;;  %v713_v44 = vsel %vm678_vm2, %v4113_v13, %v3174_v59  ;;  %v697_v59 = vsel %vm678_vm2, %v5824_v35, %v3195_v47  ;;  %v674_v47 = vrot.slane %v4125_v17, 2 }
  0xc6   : > { %v602_v60 = vpop.permute.xlu0 %601 }
  0xc7   : > { %982 = vmatmul.mubr.f32.gmra.mxu0 %v690_v29  ;;  %v604_v24 = vpop.permute.xlu1 %603 }
  0xc8   : > { %1102 = vmatmul.mubr.f32.gmra.mxu1 %v721_v58  ;;  %986 = vmatprep.mubr.f32.mxu0 %v711_v36  ;;  %v5823_v58 = vld [vmem:[#allocation6_spill] sm:$0xff]  ;;  %v717_v36 = vsel %vm678_vm2, %v4143_v49, %v3194_v33 }
  0xc9   : > { %1106 = vmatprep.mubr.f32.mxu1 %v686_v16  ;;  %v723_v16 = vsel %vm678_vm2, %v3707_v52, %v602_v60  ;;  %v714_v52 = vsel %vm678_vm2, %v4118_v51, %v3179_v7  ;;  %v698_v7 = vsel %vm678_vm2, %v5826_v0, %v3200_v6  ;;  %v1930_v0 = vld [vmem:[%s5768_s3 + $0xf0] sm:$0xff] }
  0xca   : > { %v606_v56 = vpop.permute.xlu0 %605 }
  0xcb   : > { %987 = vmatmul.mubr.f32.gmra.mxu0 %v691_v11  ;;  %v608_v38 = vpop.permute.xlu1 %607 }
  0xcc   : > { %1107 = vmatmul.mubr.f32.gmra.mxu1 %v722_v48  ;;  %991 = vmatprep.mubr.f32.mxu0 %v712_v41  ;;  %v5825_v48 = vld [vmem:[#allocation7_spill] sm:$0xff] }
  0xcd   : > { %1111 = vmatprep.mubr.f32.mxu1 %v687_v15  ;;  %v724_v15 = vsel %vm678_vm2, %v3718_v57, %v604_v24  ;;  %v715_v57 = vsel %vm678_vm2, %v4137_v1, %v3184_v8 }
  0xce   : > { %v610_v23 = vpop.permute.xlu0 %609 }
  0xcf   : > { %992 = vmatmul.mubr.f32.gmra.mxu0 %v692_v62  ;;  %v612_v27 = vpop.permute.xlu1 %611 }
  0xd0   : > { %1112 = vmatmul.mubr.f32.gmra.mxu1 %v723_v16  ;;  %996 = vmatprep.mubr.f32.mxu0 %v713_v44  ;;  %v728_v41 = vsel %vm678_vm2, %v5825_v48, %v612_v27  ;;  %v1931_v48 = vld [vmem:[%s5768_s3 + $0xf8] sm:$0xff] }
  0xd1   : > { %1116 = vmatprep.mubr.f32.mxu1 %v688_v5  ;;  %v725_v5 = vsel %vm678_vm2, %v3745_v3, %v606_v56  ;;  %v716_v3 = vsel %vm678_vm2, %v4140_v25, %v3189_v31  ;;  %v5832_v31 = vld [vmem:[#allocation17_spill] sm:$0xff]  ;;  %2755 = vmatprep.subr.mxu1 %v1931_v48  ;;  %v1942_v48 = vld [vmem:[%s5768_s3 + $0x150] sm:$0xff] }
  0xd2   : > { %v614_v60 = vpop.permute.xlu0 %613 }
  0xd3   : > { %997 = vmatmul.mubr.f32.gmra.mxu0 %v693_v12  ;;  %v729_v16 = vsel %vm678_vm2, %v5827_v32, %v614_v60  ;;  %v616_v44 = vpop.permute.xlu1 %615 }
  0xd4   : > { %1117 = vmatmul.mubr.f32.gmra.mxu1 %v724_v15  ;;  %1001 = vmatprep.mubr.f32.mxu0 %v714_v52 }
  0xd5   : > { %1121 = vmatprep.mubr.f32.mxu1 %v689_v37  ;;  %v726_v37 = vsel %vm678_vm2, %v5821_v46, %v608_v38 }
  0xd6   : > { %v618_v10 = vpop.permute.xlu0 %617 }
  0xd7   : > { %1002 = vmatmul.mubr.f32.gmra.mxu0 %v694_v18  ;;  %v620_v15 = vpop.permute.xlu1 %619 }
  0xd8   : > { %1122 = vmatmul.mubr.f32.gmra.mxu1 %v725_v5  ;;  %1006 = vmatprep.mubr.f32.mxu0 %v715_v57 }
  0xd9   : > { %1126 = vmatprep.mubr.f32.mxu1 %v690_v29  ;;  %v727_v29 = vsel %vm678_vm2, %v5823_v58, %v610_v23 }
  0xda   : > { %v622_v52 = vpop.permute.xlu0 %621 }
  0xdb   : > { %1007 = vmatmul.mubr.f32.gmra.mxu0 %v695_v19  ;;  %v624_v56 = vpop.permute.xlu1 %623 }
  0xdc   : > { %1127 = vmatmul.mubr.f32.gmra.mxu1 %v726_v37  ;;  %1011 = vmatprep.mubr.f32.mxu0 %v716_v3  ;;  %v734_v5 = vsel %vm678_vm2, %v5832_v31, %v624_v56  ;;  %v1911_v56 = vld [vmem:[%s5768_s3 + $0x58] sm:$0xff] }
  0xdd   : > { %1131 = vmatprep.mubr.f32.mxu1 %v691_v11  ;;  %v718_v11 = vsel %vm678_vm2, %v4159_v2, %v3199_v53 }
  0xdf   : > { %1012 = vmatmul.mubr.f32.gmra.mxu0 %v696_v22 }
  0xe0   : > { %1132 = vmatmul.mubr.f32.gmra.mxu1 %v727_v29  ;;  %1016 = vmatprep.mubr.f32.mxu0 %v717_v36 }
  0xe1   : > { %1136 = vmatprep.mubr.f32.mxu1 %v692_v62  ;;  %v5828_v62 = vld [vmem:[#allocation9_spill] sm:$0xff] }
  0xe2   : > { %v730_v24 = vsel %vm678_vm2, %v5828_v62, %v616_v44  ;;  %v1929_v44 = vld [vmem:[%s5768_s3 + $0xe8] sm:$0xff] }
  0xe3   : > { %1017 = vmatmul.mubr.f32.gmra.mxu0 %v697_v59 }
  0xe4   : > { %1137 = vmatmul.mubr.f32.gmra.mxu1 %v728_v41  ;;  %1021 = vmatprep.mubr.f32.mxu0 %v718_v11  ;;  %v1915_v41 = vld [vmem:[%s5768_s3 + $0x78] sm:$0xff] }
  0xe5   : > { %1141 = vmatprep.mubr.f32.mxu1 %v693_v12  ;;  %v5829_v12 = vld [vmem:[#allocation12_spill] sm:$0xff]  ;;  %2756 = vmatpush3.msra.mxu1 %v1915_v41 }
  0xe6   : > { %v731_v8 = vsel %vm678_vm2, %v5829_v12, %v618_v10  ;;  %2757 = vmatprep.subr.mxu1 %v1930_v0  ;;  %v1913_v10 = vld [vmem:[%s5768_s3 + $0x68] sm:$0xff] }
  0xe7   : > { %1022 = vmatmul.mubr.f32.gmra.mxu0 %v698_v7  ;;  %v1957_v0 = vld [vmem:[%s5768_s3 + $0x1c8] sm:$0xff] }
  0xe8   : > { %1142 = vmatmul.mubr.f32.gmra.mxu1 %v729_v16  ;;  %2955 = vmatprep.mubr.msk.f32.mxu0 %vm678_vm2, %v3987_v39  ;;  %v5830_v39 = vld [vmem:[#allocation13_spill] sm:$0xff] }
  0xe9   : > { %1146 = vmatprep.mubr.f32.mxu1 %v694_v18 }
  0xeb   : > { %2956 = vmatmul.mubr.msk.f32.vlgmr.msra.gmra.mxu0 %vm678_vm2, %v3992_v50  ;;  %v732_v50 = vsel %vm678_vm2, %v5830_v39, %v620_v15  ;;  %v1928_v15 = vld [vmem:[%s5768_s3 + $0xe0] sm:$0xff]  ;;  %v1927_v39 = vld [vmem:[%s5768_s3 + $0xd8] sm:$0xff] }
  0xec   : > { %1147 = vmatmul.mubr.f32.gmra.mxu1 %v730_v24  ;;  %2958 = vmatprep.mubr.msk.f32.mxu0 %vm678_vm2, %v4012_v63  ;;  %v3203_v63 = vpop.permute.xlu0 %3202 }
  0xed   : > { %1151 = vmatprep.mubr.f32.mxu1 %v695_v19  ;;  %v3204_v18 = vunpack.i.l.bf16 %v3203_v63 }
  0xef   : > { %2959 = vmatmul.mubr.msk.f32.gmra.mxu0 %vm678_vm2, %v4017_v34  ;;  %v733_v34 = vsel %vm678_vm2, %v5831_v45, %v622_v52  ;;  %v1912_v52 = vld [vmem:[%s5768_s3 + $0x60] sm:$0xff]  ;;  %v1926_v45 = vld [vmem:[%s5768_s3 + $0xd0] sm:$0xff] }
  0xf0   : > { %1152 = vmatmul.mubr.f32.gmra.mxu1 %v731_v8  ;;  %2961 = vmatprep.mubr.msk.f32.mxu0 %vm678_vm2, %v4037_v43  ;;  %v3208_v43 = vpop.permute.xlu1 %3207  ;;  %v3213_v4 = vpop.permute.xlu0 %3212 }
  0xf1   : > { %1156 = vmatprep.mubr.f32.mxu1 %v696_v22  ;;  %v3209_v57 = vunpack.i.l.bf16 %v3208_v43  ;;  %v3214_v19 = vunpack.i.l.bf16 %v3213_v4  ;;  %v5837_v22 = vld [vmem:[#allocation22_spill] sm:$0xff] }
  0xf3   : > { %2962 = vmatmul.mubr.msk.f32.gmra.mxu0 %vm678_vm2, %v4042_v21  ;;  %v3205_v21 = vunpack.i.h.bf16 %v3203_v63  ;;  %v740_v33 = vsel %vm678_vm2, %v3921_v9, %v3209_v57  ;;  %v741_v23 = vsel %vm678_vm2, %v4122_v28, %v3214_v19 }
  0xf4   : > { %1157 = vmatmul.mubr.f32.gmra.mxu1 %v732_v50  ;;  %2964 = vmatprep.mubr.msk.f32.mxu0 %vm678_vm2, %v4064_v26  ;;  %v5833_v26 = vld [vmem:[#allocation18_spill] sm:$0xff]  ;;  %v3218_v46 = vpop.permute.xlu1 %3217 }
  0xf5   : > { %1161 = vmatprep.mubr.f32.mxu1 %v697_v59  ;;  %v739_v38 = vsel %vm678_vm2, %v5833_v26, %v3204_v18  ;;  %v3219_v3 = vunpack.i.l.bf16 %v3218_v46  ;;  %v1910_v18 = vld [vmem:[%s5768_s3 + $0x50] sm:$0xff]  ;;  %v1924_v26 = vld [vmem:[%s5768_s3 + $0xc0] sm:$0xff] }
  0xf7   : > { %2965 = vmatmul.mubr.msk.f32.gmra.mxu0 %vm678_vm2, %v4069_v42  ;;  %v3210_v42 = vunpack.i.h.bf16 %v3208_v43  ;;  %v742_v30 = vsel %vm678_vm2, %v4125_v17, %v3219_v3  ;;  %v1945_v3 = vld [vmem:[%s5768_s3 + $0x168] sm:$0xff] }
  0xf8   : > { %1162 = vmatmul.mubr.f32.gmra.mxu1 %v733_v34  ;;  %2967 = vmatprep.mubr.msk.f32.mxu0 %vm678_vm2, %v4086_v14  ;;  %v5834_v14 = vld [vmem:[#allocation19_spill] sm:$0xff] }
  0xf9   : > { %1166 = vmatprep.mubr.f32.mxu1 %v698_v7  ;;  %v735_v20 = vsel %vm678_vm2, %v5834_v14, %v3205_v21  ;;  %v1914_v7 = vld [vmem:[%s5768_s3 + $0x70] sm:$0xff]  ;;  %v1925_v21 = vld [vmem:[%s5768_s3 + $0xc8] sm:$0xff]  ;;  %v1923_v14 = vld [vmem:[%s5768_s3 + $0xb8] sm:$0xff] }
  0xfa   : > { %2758 = vmatpush3.msra.mxu1 %v1914_v7 }
  0xfb   : > { %2968 = vmatmul.mubr.msk.f32.gmra.mxu0 %vm678_vm2, %v4091_v61  ;;  %v3215_v61 = vunpack.i.h.bf16 %v3213_v4  ;;  %2759 = vmatprep.subr.mxu1 %v1929_v44 }
  0xfc   : > { %1167 = vmatmul.mubr.f32.gmra.mxu1 %v734_v5  ;;  %2970 = vmatprep.mubr.msk.f32.mxu0 %vm678_vm2, %v4113_v13  ;;  %v5835_v13 = vld [vmem:[#allocation20_spill] sm:$0xff]  ;;  %v1909_v5 = vld [vmem:[%s5768_s3 + $0x48] sm:$0xff] }
  0xfd   : > { %1171 = vmatprep.mubr.f32.mxu1 %v739_v38  ;;  %v736_v37 = vsel %vm678_vm2, %v5835_v13, %v3210_v42  ;;  %v737_v9 = vsel %vm678_vm2, %v4153_v40, %v3215_v61  ;;  %2760 = vmatpush3.msra.mxu1 %v1913_v10  ;;  %v1963_v38 = vld [vmem:[%s5768_s3 + $0x1f8] sm:$0xff]  ;;  %v1908_v42 = vld [vmem:[%s5768_s3 + $0x40] sm:$0xff]  ;;  %v1961_v61 = vld [vmem:[%s5768_s3 + $0x1e8] sm:$0xff] }
  0xfe   : > { %2761 = vmatprep.subr.mxu1 %v1928_v15  ;;  %2835 = vmatprep.subr.mxu0 %v1963_v38 }
  0xff   : > { %2971 = vmatmul.mubr.msk.f32.gmra.mxu0 %vm678_vm2, %v4118_v51  ;;  %v3220_v51 = vunpack.i.h.bf16 %v3218_v46  ;;  %2762 = vmatpush3.msra.mxu1 %v1912_v52  ;;  %v1946_v46 = vld [vmem:[%s5768_s3 + $0x170] sm:$0xff]  ;;  %v1917_v52 = vld [vmem:[%s5768_s3 + $0x88] sm:$0xff] }
 0x100   : > { %1172 = vmatmul.mubr.f32.gmra.mxu1 %v735_v20  ;;  %2973 = vmatprep.mubr.msk.f32.mxu0 %vm678_vm2, %v4137_v1  ;;  %v673_v1 = vrot.slane %v4122_v28, 2  ;;  %v1947_v20 = vld [vmem:[%s5768_s3 + $0x178] sm:$0xff] }
 0x101   : > { %1176 = vmatprep.mubr.f32.mxu1 %v740_v33  ;;  %v738_v40 = vsel %vm678_vm2, %v4162_v54, %v3220_v51  ;;  %2763 = vmatprep.subr.mxu1 %v1927_v39  ;;  %v1962_v33 = vld [vmem:[%s5768_s3 + $0x1f0] sm:$0xff] }
 0x102   : > { %v675_v28 = vsel %vm429_vm1, %v673_v1, %v674_v47  ;;  %2764 = vmatpush3.msra.mxu1 %v1911_v56  ;;  %2836 = vmatpush3.msra.mxu0 %v1947_v20  ;;  %v1922_v51 = vld [vmem:[%s5768_s3 + $0xb0] sm:$0xff]  ;;  %v1901_v56 = vld [vmem:[%s5768_s3 + $0x8] sm:$0xff] }
 0x103   : > { %2974 = vmatmul.mubr.msk.f32.gmra.mxu0 %vm678_vm2, %v4140_v25  ;;  %v5836_v25 = vld [vmem:[#allocation21_spill] sm:$0xff]  ;;  %2765 = vmatprep.subr.mxu1 %v1926_v45 }
 0x104   : > { %1177 = vmatmul.mubr.f32.gmra.mxu1 %v736_v37  ;;  %2976 = vmatprep.mubr.msk.f32.mxu0 %vm678_vm2, %v4143_v49  ;;  %v676_v49 = vrot.slane %v5836_v25, 2  ;;  %v1907_v37 = vld [vmem:[%s5768_s3 + $0x38] sm:$0xff]  ;;  %v1916_v45 = vld [vmem:[%s5768_s3 + $0x80] sm:$0xff] }
 0x105   : > { %1181 = vmatprep.mubr.f32.mxu1 %v741_v23  ;;  %2766 = vmatpush3.msra.mxu1 %v1910_v18  ;;  %v1900_v18 = vld [vmem:[%s5768_s3] sm:$0xff] }
 0x106   : > { %v677_v17 = vsel %vm429_vm1, %v674_v47, %v676_v49  ;;  %2767 = vmatprep.subr.mxu1 %v1925_v21  ;;  %2837 = vmatprep.subr.mxu0 %v1962_v33  ;;  %v1906_v47 = vld [vmem:[%s5768_s3 + $0x30] sm:$0xff]  ;;  %v1921_v49 = vld [vmem:[%s5768_s3 + $0xa8] sm:$0xff] }
 0x107   : > { %2977 = vmatmul.mubr.msk.f32.gmra.mxu0 %vm678_vm2, %v4159_v2  ;;  %2768 = vmatpush3.msra.mxu1 %v1909_v5 }
 0x108   : > { %1182 = vmatmul.mubr.f32.gmra.mxu1 %v737_v9  ;;  %2979 = vmatprep.mubr.msk.f32.mxu0 %vm678_vm2, %v4182_v55  ;;  %v1960_v9 = vld [vmem:[%s5768_s3 + $0x1e0] sm:$0xff] }
 0x109   : > { %1186 = vmatprep.mubr.f32.mxu1 %v742_v30  ;;  %2769 = vmatprep.subr.mxu1 %v1924_v26  ;;  %v1944_v30 = vld [vmem:[%s5768_s3 + $0x160] sm:$0xff] }
 0x10a   : > { %2770 = vmatpush3.msra.mxu1 %v1908_v42  ;;  %2838 = vmatpush3.msra.mxu0 %v1946_v46 }
 0x10b   : > { %2980 = vmatmul.mubr.msk.f32.gmra.mxu0 %vm678_vm2, %v5837_v22  ;;  %2771 = vmatprep.subr.mxu1 %v1923_v14  ;;  %v1905_v22 = vld [vmem:[%s5768_s3 + $0x28] sm:$0xff] }
 0x10c   : > { %1187 = vmatmul.mubr.f32.gmra.mxu1 %v738_v40  ;;  %2982 = vmatprep.mubr.msk.f32.mxu0 %vm678_vm2, %v675_v28  ;;  %v1959_v40 = vld [vmem:[%s5768_s3 + $0x1d8] sm:$0xff] }
 0x10d   : > { %2839 = vmatprep.subr.mxu0 %v1961_v61  ;;  %2772 = vmatpush3.msra.mxu1 %v1907_v37 }
 0x10e   : > { %2840 = vmatpush3.msra.mxu0 %v1945_v3  ;;  %2773 = vmatprep.subr.mxu1 %v1922_v51 }
 0x10f   : > { %2983 = vmatmul.mubr.msk.f32.gmra.mxu0 %vm678_vm2, %v677_v17  ;;  %2841 = vmatprep.subr.mxu0 %v1960_v9  ;;  %v1943_v17 = vld [vmem:[%s5768_s3 + $0x158] sm:$0xff]  ;;  %v4649_v9 = vld [vmem:[%s5767_s2] ss:$0 sm:$0xff] }
 0x110   : > { %2774 = vmatpush3.msra.mxu1 %v1906_v47  ;;  %2842 = vmatpush3.msra.mxu0 %v1944_v30  ;;  %v4653_v47 = vstv %s2701_s8  ;;  %s2726_s8 = sshll.u32 %s3441_s21, 4 }
 0x111   : > { %2775 = vmatprep.subr.mxu1 %v1921_v49  ;;  %2843 = vmatprep.subr.mxu0 %v1959_v40  ;;  %vm1389_vm3 = vcmp.ge.s32.totalorder %v4653_v47, 0  ;;  %vm1399_vm4 = vcmp.lt.s32.totalorder %v4653_v47, 16  ;;  %s2590_s21 = sadd.s32 %s2726_s8, %s2722_s10  ;;  %s3369_s8 = sshll.u32 %s3461_s27, 4  ;;  %s3370_s8 = int_to_ptr.vmem [resolvable:$false] %s3369_s8 }
 0x112   : > { %2776 = vmatpush3.msra.mxu1 %v1905_v22  ;;  %2844 = vmatpush3.msra.mxu0 %v1943_v17  ;;  %v1380_v22 = vadd.s32 1, %v4653_v47  ;;  %vm4674_vm5 = vmand %vm1389_vm3, %vm1399_vm4  ;;  %s2723_s22 = sshll.u32 %s2590_s21, 7  ;;  %s3371_s10 = scalar_lea.vmem %s3370_s8, 4096 }
 0x113   : > { %s5703_s13 = scalar_lea.hbm %s5770_s5, %s2723_s22  ;;  %p3372_p2 = scmp.lt.s32.totalorder %s5705_s12, %s3370_s8 }
 0x114   : > { %vm1390_vm7 = vcmp.ge.s32.totalorder %v1380_v22, 0  ;;  %vm1400_vm8 = vcmp.lt.s32.totalorder %v1380_v22, 16  ;;  %p3373_p4 = scmp.lt.s32.totalorder %s3371_s10, %s3365_s16 }
 0x115   : > { %vm4692_vm13 = vmand %vm1390_vm7, %vm1400_vm8 }
 0x116   : > { %p3374_p5 = por %p3373_p4, %p3372_p2 }
 0x118   : > { %p3375_p6 = pnand %p3374_p5, %p3368_p1 }
 0x15b   : > { %v4452_v2 = vpop.f32.mrf.mxu0 }
 0x15c   : > { %v929_v17 = vadd.f32 %v4649_v9, %v4452_v2 }
 0x15d   : > { %v930_v55 = vpop.f32.mrf.mxu0 }
 0x15f   : > { %v4454_v53 = vpop.f32.mrf.mxu0 }
 0x160   : > { %v934_v30 = vadd.f32 %v4649_v9, %v4454_v53  ;;  %v4667_v53 = vadd.s32 3, %v4653_v47 }
 0x161   : > { %v935_v58 = vpop.f32.mrf.mxu0 }
 0x162   : > { %v1920_v58 = vld [vmem:[%s5768_s3 + $0xa0] sm:$0xff]  ;;  %vm1392_vm11 = vcmp.ge.s32.totalorder %v4667_v53, 0  ;;  %vm1402_vm12 = vcmp.lt.s32.totalorder %v4667_v53, 16 }
 0x163   : > { %v4456_v29 = vpop.f32.mrf.mxu0  ;;  %2777 = vmatprep.subr.mxu1 %v1920_v58  ;;  %vm4799_vm7 = vmand %vm1392_vm11, %vm1402_vm12 }
 0x165   : > { %v940_v54 = vpop.f32.mrf.mxu0 }
 0x166   : > { %v1958_v54 = vld [vmem:[%s5768_s3 + $0x1d0] sm:$0xff] }
 0x167   : > { %v4458_v36 = vpop.f32.mrf.mxu0  ;;  %2845 = vmatprep.subr.mxu0 %v1958_v54 }
 0x168   : > { %2846 = vmatpush3.msra.mxu0 %v1942_v48 }
 0x169   : > { %v945_v27 = vpop.f32.mrf.mxu0  ;;  %2847 = vmatprep.subr.mxu0 %v1957_v0 }
 0x16b   : > { %v4460_v6 = vpop.f32.mrf.mxu0 }
 0x16d   : > { %v950_v35 = vpop.f32.mrf.mxu0 }
 0x16e   : > { %v1904_v35 = vld [vmem:[%s5768_s3 + $0x20] sm:$0xff] }
 0x16f   : > { %v4462_v59 = vpop.f32.mrf.mxu0  ;;  %2778 = vmatpush3.msra.mxu1 %v1904_v35  ;;  %v944_v35 = vadd.f32 %v4649_v9, %v4458_v36 }
 0x171   : > { %v955_v11 = vpop.f32.mrf.mxu0 }
 0x172   : > { %v1919_v11 = vld [vmem:[%s5768_s3 + $0x98] sm:$0xff] }
 0x173   : > { %v4470_v60 = vpop.f32.mrf.mxu0  ;;  %2779 = vmatprep.subr.mxu1 %v1919_v11 }
 0x175   : > { %v960_v32 = vpop.f32.mrf.mxu0 }
 0x176   : > { %v1903_v32 = vld [vmem:[%s5768_s3 + $0x18] sm:$0xff] }
 0x177   : > { %v4478_v16 = vpop.f32.mrf.mxu0  ;;  %2780 = vmatpush3.msra.mxu1 %v1903_v32  ;;  %v939_v32 = vadd.f32 %v4649_v9, %v4456_v29 }
 0x178   : > { %v964_v22 = vadd.f32 %v4649_v9, %v4478_v16  ;;  %v4731_v16 = vadd.s32 9, %v4653_v47 }
 0x179   : > { %v965_v62 = vpop.f32.mrf.mxu0 }
 0x17a   : > { %v1918_v62 = vld [vmem:[%s5768_s3 + $0x90] sm:$0xff] }
 0x17b   : > { %v4483_v24 = vpop.f32.mrf.mxu0  ;;  %2781 = vmatprep.subr.mxu1 %v1918_v62 }
 0x17d   : > { %v970_v12 = vpop.f32.mrf.mxu0 }
 0x17e   : > { %v1902_v12 = vld [vmem:[%s5768_s3 + $0x10] sm:$0xff] }
 0x17f   : > { %v4488_v8 = vpop.f32.mrf.mxu0  ;;  %2782 = vmatpush3.msra.mxu1 %v1902_v12 }
 0x180   : > { %v4499_v50 = vpop.f32.mrf.mxu1  ;;  %2783 = vmatprep.subr.mxu1 %v1917_v52 }
 0x181   : > { %v975_v63 = vpop.f32.mrf.mxu0  ;;  %2784 = vmatpush3.msra.mxu1 %v1901_v56  ;;  %v1094_v48 = vadd.f32 %v4499_v50, %v929_v17 }
 0x182   : > { %v1095_v34 = vpop.f32.mrf.mxu1  ;;  %2785 = vmatprep.subr.mxu1 %v1916_v45  ;;  %v4774_v45 = vld [vmem:[%s5768_s3 + $0x238] sm:$0xff] }
 0x183   : > { %v4510_v43 = vpop.f32.mrf.mxu0  ;;  %2786 = vmatpush3.msra.mxu1 %v1900_v18  ;;  %v4697_v18 = vadd.s32 4, %v4653_v47 }
 0x184   : > { %v4515_v31 = vpop.f32.mrf.mxu1  ;;  %2985 = vmatprep.subr.mxu1 %v4774_v45 }
 0x185   : > { %v980_v57 = vpop.f32.mrf.mxu0  ;;  %vm1393_vm14 = vcmp.ge.s32.totalorder %v4697_v18, 0  ;;  %vm1403_vm15 = vcmp.lt.s32.totalorder %v4697_v18, 16  ;;  %v1937_v18 = vld [vmem:[%s5768_s3 + $0x128] sm:$0xff] }
 0x186   : > { %v1100_v4 = vpop.f32.mrf.mxu1 }
 0x187   : > { %v4535_v19 = vpop.f32.mrf.mxu0 }
 0x188   : > { %v4546_v13 = vpop.f32.mrf.mxu1 }
 0x189   : > { %v985_v23 = vpop.f32.mrf.mxu0  ;;  %v1104_v12 = vadd.f32 %v4546_v13, %v939_v32  ;;  %v4700_v13 = vadd.s32 5, %v4653_v47 }
 0x18a   : > { %v1105_v1 = vpop.f32.mrf.mxu1 }
 0x18b   : > { %v4566_v25 = vpop.f32.mrf.mxu0  ;;  %vm1394_vm4 = vcmp.ge.s32.totalorder %v4700_v13, 0 }
 0x18c   : > { %v4574_v28 = vpop.f32.mrf.mxu1 }
 0x18d   : > { %v990_v55 = vpop.f32.mrf.mxu0 }
 0x18e   : > { %v1110_v27 = vpop.f32.mrf.mxu1  ;;  %v1099_v55 = vadd.f32 %v4515_v31, %v934_v30  ;;  %v4737_v31 = vadd.f32 %v4649_v9, %v4483_v24 }
 0x18f   : > { %v4594_v41 = vpop.f32.mrf.mxu0  ;;  %v1381_v27 = vadd.s32 2, %v4653_v47 }
 0x190   : > { %v4602_v7 = vpop.f32.mrf.mxu1 }
 0x191   : > { %v995_v44 = vpop.f32.mrf.mxu0  ;;  %vm1391_vm9 = vcmp.ge.s32.totalorder %v1381_v27, 0  ;;  %vm1401_vm10 = vcmp.lt.s32.totalorder %v1381_v27, 16  ;;  %v1956_v27 = vld [vmem:[%s5768_s3 + $0x1c0] sm:$0xff] }
 0x192   : > { %v1115_v10 = vpop.f32.mrf.mxu1  ;;  %v1109_v44 = vadd.f32 %v4574_v28, %v944_v35  ;;  %v954_v28 = vadd.f32 %v4649_v9, %v4462_v59  ;;  %vm4746_vm3 = vmand %vm1391_vm9, %vm1401_vm10 }
 0x193   : > { %v4613_v15 = vpop.f32.mrf.mxu0  ;;  %vm4864_vm10 = vmand %vm1393_vm14, %vm1403_vm15 }
 0x194   : > { %v4618_v39 = vpop.f32.mrf.mxu1 }
 0x195   : > { %v1000_v63 = vpop.f32.mrf.mxu0 }
 0x196   : > { %v1120_v34 = vpop.f32.mrf.mxu1 }
 0x197   : > { %v4629_v21 = vpop.f32.mrf.mxu0 }
 0x198   : > { %v4631_v5 = vpop.f32.mrf.mxu1 }
 0x199   : > { %v1005_v57 = vpop.f32.mrf.mxu0 }
 0x19a   : > { %v1125_v26 = vpop.f32.mrf.mxu1  ;;  %v4703_v57 = vadd.s32 6, %v4653_v47 }
 0x19b   : > { %v4633_v38 = vpop.f32.mrf.mxu0 }
 0x19c   : > { %v4635_v4 = vpop.f32.mrf.mxu1  ;;  %vm1395_vm8 = vcmp.ge.s32.totalorder %v4703_v57, 0  ;;  %vm1405_vm9 = vcmp.lt.s32.totalorder %v4703_v57, 16  ;;  %v1009_v57 = vadd.f32 %v4649_v9, %v4633_v38 }
 0x19d   : > { %v1010_v42 = vpop.f32.mrf.mxu0  ;;  %vm4994_vm14 = vmand %vm1395_vm8, %vm1405_vm9 }
 0x19e   : > { %v1130_v14 = vpop.f32.mrf.mxu1 }
 0x19f   : > { %v4637_v20 = vpop.f32.mrf.mxu0 }
 0x1a0   : > { %v4639_v33 = vpop.f32.mrf.mxu1 }
 0x1a1   : > { %v1015_v46 = vpop.f32.mrf.mxu0 }
 0x1a2   : > { %v1135_v61 = vpop.f32.mrf.mxu1  ;;  %v4708_v46 = vadd.s32 7, %v4653_v47 }
 0x1a3   : > { %v4642_v37 = vpop.f32.mrf.mxu0  ;;  %v949_v61 = vadd.f32 %v4649_v9, %v4460_v6 }
 0x1a4   : > { %v4644_v3 = vpop.f32.mrf.mxu1  ;;  %vm1396_vm11 = vcmp.ge.s32.totalorder %v4708_v46, 0  ;;  %vm1406_vm12 = vcmp.lt.s32.totalorder %v4708_v46, 16 }
 0x1a5   : > { %v1020_v23 = vpop.f32.mrf.mxu0  ;;  %v1114_v6 = vadd.f32 %v4602_v7, %v949_v61  ;;  %v1129_v7 = vadd.f32 %v4635_v4, %v964_v22  ;;  %v1941_v4 = vld [vmem:[%s5768_s3 + $0x148] sm:$0xff]  ;;  %v1952_v61 = vld [vmem:[%s5768_s3 + $0x1a0] sm:$0xff]  ;;  %vm5030_vm15 = vmand %vm1396_vm11, %vm1406_vm12 }
 0x1a6   : > { %v1140_v51 = vpop.f32.mrf.mxu1  ;;  %v1119_v23 = vadd.f32 %v4618_v39, %v954_v28  ;;  %2848 = vmatpush3.msra.mxu0 %v1941_v4  ;;  %v1955_v28 = vld [vmem:[%s5768_s3 + $0x1b8] sm:$0xff] }
 0x1a7   : > { %v4651_v1 = vpop.f32.mrf.mxu0  ;;  %2849 = vmatprep.subr.mxu0 %v1956_v27 }
 0x1a8   : > { %v4657_v49 = vpop.f32.mrf.mxu1 }
 0x1a9   : > { %v1025_v40 = vpop.f32.mrf.mxu0 }
 0x1aa   : > { %v1145_v58 = vpop.f32.mrf.mxu1 }
 0x1ab   : > { %v2957_v54 = vpop.f32.mrf.mxu0 }
 0x1ac   : > { %v1264_v11 = vadd.f32 %v2957_v54, %v1099_v55  ;;  %v4672_v2 = vpop.f32.mrf.mxu1  ;;  %v4722_v54 = vadd.s32 8, %v4653_v47 }
 0x1ad   : > { %v1258_v0 = vpop.f32.mrf.mxu0 }
 0x1ae   : > { %v1358_v62 = vmax.f32 %v1264_v11, 0.0  ;;  %v1259_v36 = vadd.f32 %v1258_v0, %v1094_v48  ;;  %v1150_v10 = vpop.f32.mrf.mxu1  ;;  %v959_v11 = vadd.f32 %v4649_v9, %v4470_v60 }
 0x1af   : > { %v2960_v50 = vpop.f32.mrf.mxu0  ;;  %v1940_v10 = vld [vmem:[%s5768_s3 + $0x140] sm:$0xff] }
 0x1b0   : > { %v1420_v52 = vsel %vm4674_vm5, %v1358_v62, 0.0  ;;  %v1357_v56 = vmax.f32 %v1259_v36, 0.0  ;;  %v1274_v63 = vadd.f32 %v2960_v50, %v1109_v44  ;;  %v4686_v29 = vpop.f32.mrf.mxu1  ;;  %v974_v50 = vadd.f32 %v4649_v9, %v4488_v8  ;;  %2850 = vmatpush3.msra.mxu0 %v1940_v10  ;;  %v1938_v10 = vld [vmem:[%s5768_s3 + $0x130] sm:$0xff] }
 0x1b1   : > { %v1268_v34 = vpop.f32.mrf.mxu0  ;;  %v1461_v51 = vrot.slane %v1420_v52, 7  ;;  %v1124_v52 = vadd.f32 %v4631_v5, %v959_v11  ;;  %2851 = vmatprep.subr.mxu0 %v1955_v28 }
 0x1b2   : > { %v1419_v26 = vsel %vm4674_vm5, %v1357_v56, 0.0  ;;  %v1360_v59 = vmax.f32 %v1274_v63, 0.0  ;;  %v1269_v42 = vadd.f32 %v1268_v34, %v1104_v12  ;;  %v1155_v14 = vpop.f32.mrf.mxu1  ;;  %v979_v12 = vadd.f32 %v4649_v9, %v4510_v43 }
 0x1b3   : > { %v1460_v30 = vrot.slane %v1419_v26, 7  ;;  %v2963_v40 = vpop.f32.mrf.mxu0  ;;  %v4777_v8 = vsel %vm1459_vm6, %v1461_v51, 0.0  ;;  %vm1404_vm5 = vcmp.lt.s32.totalorder %v4700_v13, 16 }
 0x1b4   : > { %v4717_v17 = vsel %vm4692_vm13, %v1360_v59, 0.0  ;;  %v1359_v55 = vmax.f32 %v1269_v42, 0.0  ;;  %v4719_v58 = vpop.f32.mrf.mxu1  ;;  %v1284_v35 = vadd.f32 %v2963_v40, %v1119_v23  ;;  %v1139_v59 = vadd.f32 %v4644_v3, %v974_v50 }
 0x1b5   : > { %v4726_v39 = vsel %vm1459_vm6, %v1460_v30, %v1461_v51  ;;  %v1278_v48 = vpop.f32.mrf.mxu0  ;;  %v1464_v44 = vrot.slane %v4717_v17, 7  ;;  %v4793_v42 = vsel %vm1459_vm6, 0.0, %v1460_v30  ;;  %v984_v40 = vadd.f32 %v4649_v9, %v4535_v19  ;;  %v1936_v17 = vld [vmem:[%s5768_s3 + $0x120] sm:$0xff] }
 0x1b6   : > { %v4742_v0 = vsel %vm4692_vm13, %v1359_v55, 0.0  ;;  %v1160_v47 = vpop.f32.mrf.mxu1  ;;  %v1362_v62 = vmax.f32 %v1284_v35, 0.0  ;;  %v1279_v24 = vadd.f32 %v1278_v48, %v1114_v6  ;;  %v1557_v51 = vrot.slane %v4726_v39, 1  ;;  %vm4919_vm13 = vmand %vm1394_vm4, %vm1404_vm5 }
 0x1b7   : > { %v1463_v60 = vrot.slane %v4742_v0, 7  ;;  %v2966_v36 = vpop.f32.mrf.mxu0  ;;  %v989_v3 = vadd.f32 %v4649_v9, %v4566_v25  ;;  %v1559_v53 = vrot.slane %v4777_v8, 1  ;;  %v994_v19 = vadd.f32 %v4649_v9, %v4594_v41  ;;  %v1939_v47 = vld [vmem:[%s5768_s3 + $0x138] sm:$0xff] }
 0x1b8   : > { %v1294_v56 = vadd.f32 %v2966_v36, %v1129_v7  ;;  %v4766_v63 = vpop.f32.mrf.mxu1  ;;  %v4786_v5 = vsel %vm4746_vm3, %v1362_v62, 0.0  ;;  %v1361_v34 = vmax.f32 %v1279_v24, 0.0  ;;  %v1556_v7 = vrot.slane %v4793_v42, 1  ;;  %v1954_v62 = vld [vmem:[%s5768_s3 + $0x1b0] sm:$0xff]  ;;  %2852 = vmatpush3.msra.mxu0 %v1939_v47 }
 0x1b9   : > { %v4782_v43 = vsel %vm1459_vm6, %v1463_v60, %v1464_v44  ;;  %v1288_v26 = vpop.f32.mrf.mxu0  ;;  %v1467_v6 = vrot.slane %v4786_v5, 7  ;;  %v4829_v24 = vadd.f32 %v4649_v9, %v4613_v15  ;;  %v4833_v41 = vadd.f32 %v4649_v9, %v4629_v21  ;;  %v1953_v15 = vld [vmem:[%s5768_s3 + $0x1a8] sm:$0xff]  ;;  %2853 = vmatprep.subr.mxu0 %v1954_v62 }
 0x1ba   : > { %v1364_v14 = vmax.f32 %v1294_v56, 0.0  ;;  %v1165_v23 = vpop.f32.mrf.mxu1  ;;  %v1423_v30 = vsel %vm4746_vm3, %v1361_v34, 0.0  ;;  %v1289_v22 = vadd.f32 %v1288_v26, %v1124_v52  ;;  %v1560_v4 = vsel %vm318_vm0, %v1557_v51, %v1559_v53  ;;  %2854 = vmatpush3.msra.mxu0 %v1938_v10 }
 0x1bb   : > { %v2969_v55 = vpop.f32.mrf.mxu0  ;;  %v1466_v35 = vrot.slane %v1423_v30, 7  ;;  %v1134_v50 = vadd.f32 %v4639_v33, %v4737_v31  ;;  %v4848_v21 = vsel %vm1459_vm6, 0.0, %v1463_v60  ;;  %v1144_v5 = vadd.f32 %v4657_v49, %v979_v12  ;;  %2855 = vmatprep.subr.mxu0 %v1953_v15 }
 0x1bc   : > { %v1304_v48 = vadd.f32 %v2969_v55, %v1139_v59  ;;  %v4812_v11 = vpop.f32.mrf.mxu1  ;;  %v4819_v25 = vsel %vm4799_vm7, %v1364_v14, 0.0  ;;  %v1363_v0 = vmax.f32 %v1289_v22, 0.0  ;;  %v1149_v34 = vadd.f32 %v4672_v2, %v984_v40  ;;  %2856 = vmatpush3.msra.mxu0 %v1937_v18  ;;  %v1951_v22 = vld [vmem:[%s5768_s3 + $0x198] sm:$0xff] }
 0x1bd   : > { %v1298_v32 = vpop.f32.mrf.mxu0  ;;  %v4836_v36 = vsel %vm1459_vm6, %v1466_v35, %v1467_v6  ;;  %v1470_v33 = vrot.slane %v4819_v25, 7  ;;  %v4873_v49 = vsel %vm1459_vm6, %v1464_v44, 0.0  ;;  %v3226_v2 = vpack.i.bf16 %v1560_v4, %v4782_v43  ;;  %2857 = vmatprep.subr.mxu0 %v1952_v61  ;;  %v1949_v25 = vld [vmem:[%s5768_s3 + $0x188] sm:$0xff] }
 0x1be   : > { %v1170_v27 = vpop.f32.mrf.mxu1  ;;  %v4852_v52 = vsel %vm4799_vm7, %v1363_v0, 0.0  ;;  %v1366_v56 = vmax.f32 %v1304_v48, 0.0  ;;  %v1558_v12 = vsel %vm318_vm0, %v1556_v7, %v1557_v51  ;;  %v1299_v59 = vadd.f32 %v1298_v32, %v1134_v50  ;;  %2858 = vmatpush3.msra.mxu0 %v1936_v17 }
 0x1bf   : > { %v2972_v28 = vpop.f32.mrf.mxu0  ;;  %v1469_v31 = vrot.slane %v4852_v52, 7  ;;  %v4887_v44 = vsel %vm1459_vm6, 0.0, %v1466_v35  ;;  %v3221_v51 = vpack.i.bf16 %v1558_v12, %v4848_v21  ;;  %v1154_v55 = vadd.f32 %v4686_v29, %v989_v3  ;;  %3227 = vrot.lane.b32.xlu1 %v3226_v2, %s3460_s17  ;;  %2859 = vmatprep.subr.mxu0 %v1951_v22  ;;  %v1935_v12 = vld [vmem:[%s5768_s3 + $0x118] sm:$0xff] }
 0x1c0   : > { %v4868_v26 = vpop.f32.mrf.mxu1  ;;  %v1314_v40 = vadd.f32 %v2972_v28, %v1149_v34  ;;  %v1561_v53 = vrot.slane %v4848_v21, 1  ;;  %v4906_v35 = vsel %vm4864_vm10, %v1366_v56, 0.0  ;;  %v1365_v48 = vmax.f32 %v1299_v59, 0.0  ;;  %v1950_v59 = vld [vmem:[%s5768_s3 + $0x190] sm:$0xff]  ;;  %2860 = vmatpush3.msra.mxu0 %v1935_v12 }
 0x1c1   : > { %v1308_v14 = vpop.f32.mrf.mxu0  ;;  %v4894_v23 = vsel %vm1459_vm6, %v1469_v31, %v1470_v33  ;;  %v1564_v0 = vrot.slane %v4873_v49, 1  ;;  %v4911_v32 = vsel %vm1459_vm6, %v1467_v6, 0.0  ;;  %v1159_v47 = vadd.f32 %v4719_v58, %v994_v19  ;;  %3222 = vrot.lane.b32.xlu0 %v3221_v51, %s3460_s17  ;;  %2861 = vmatprep.subr.mxu0 %v1950_v59 }
 0x1c2   : > { %v1175_v30 = vpop.f32.mrf.mxu1  ;;  %v1368_v29 = vmax.f32 %v1314_v40, 0.0  ;;  %v1566_v4 = vrot.slane %v4887_v44, 1  ;;  %v4928_v6 = vsel %vm4864_vm10, %v1365_v48, 0.0  ;;  %v1562_v58 = vrot.slane %v4782_v43, 1  ;;  %v1934_v40 = vld [vmem:[%s5768_s3 + $0x110] sm:$0xff] }
 0x1c3   : > { %v2975_v7 = vpop.f32.mrf.mxu0  ;;  %v1309_v19 = vadd.f32 %v1308_v14, %v1144_v5  ;;  %v1473_v13 = vrot.slane %v4906_v35, 7  ;;  %v1472_v10 = vrot.slane %v4928_v6, 7  ;;  %v1567_v50 = vrot.slane %v4836_v36, 1  ;;  %2862 = vmatpush3.msra.mxu0 %v1934_v40 }
 0x1c4   : > { %v4923_v62 = vpop.f32.mrf.mxu1  ;;  %v1324_v15 = vadd.f32 %v2975_v7, %v1159_v47  ;;  %v4936_v28 = vsel %vm4919_vm13, %v1368_v29, 0.0  ;;  %v4939_v34 = vsel %vm318_vm0, %v1562_v58, %v1564_v0  ;;  %v4942_v60 = vsel %vm318_vm0, %v1561_v53, %v1562_v58  ;;  %2863 = vmatprep.subr.mxu0 %v1949_v25  ;;  %v1932_v25 = vld [vmem:[%s5768_s3 + $0x100] sm:$0xff] }
 0x1c5   : > { %v1318_v27 = vpop.f32.mrf.mxu0  ;;  %v1367_v5 = vmax.f32 %v1309_v19, 0.0  ;;  %v1569_v14 = vrot.slane %v4911_v32, 1  ;;  %v4956_v18 = vsel %vm1459_vm6, %v1472_v10, %v1473_v13  ;;  %v3236_v61 = vpack.i.bf16 %v4939_v34, %v4836_v36 }
 0x1c6   : > { %v1180_v56 = vpop.f32.mrf.mxu1  ;;  %v3231_v17 = vpack.i.bf16 %v4942_v60, %v4887_v44  ;;  %v4970_v30 = vsel %vm1459_vm6, %v1470_v33, 0.0  ;;  %v4975_v22 = vsel %vm1459_vm6, 0.0, %v1469_v31  ;;  %v1169_v53 = vadd.f32 %v4812_v11, %v4833_v41 }
 0x1c7   : > { %v2978_v2 = vpop.f32.mrf.mxu0  ;;  %v4981_v48 = vsel %vm4919_vm13, %v1367_v5, 0.0  ;;  %v1476_v33 = vrot.slane %v4936_v28, 7  ;;  %3237 = vrot.lane.b32.xlu1 %v3236_v61, %s3460_s17  ;;  %v1370_v31 = vmax.f32 %v1324_v15, 0.0  ;;  %v4999_v41 = vsel %vm318_vm0, %v1567_v50, %v1569_v14  ;;  %v1933_v61 = vld [vmem:[%s5768_s3 + $0x108] sm:$0xff] }
 0x1c8   : > { %v4962_v51 = vpop.f32.mrf.mxu1  ;;  %3232 = vrot.lane.b32.xlu0 %v3231_v17, %s3460_s17  ;;  %v1475_v52 = vrot.slane %v4981_v48, 7  ;;  %v3246_v47 = vpack.i.bf16 %v4999_v41, %v4894_v23  ;;  %v5004_v29 = vsel %vm318_vm0, %v1566_v4, %v1567_v50  ;;  %v1319_v3 = vadd.f32 %v1318_v27, %v1154_v55  ;;  %2864 = vmatpush3.msra.mxu0 %v1933_v61 }
 0x1c9   : > { %v1328_v7 = vpop.f32.mrf.mxu0  ;;  %v1334_v58 = vadd.f32 %v2978_v2, %v1169_v53  ;;  %v1164_v15 = vadd.f32 %v4766_v63, %v4829_v24  ;;  %v3241_v55 = vpack.i.bf16 %v5004_v29, %v4975_v22  ;;  %v1571_v27 = vrot.slane %v4975_v22, 1 }
 0x1ca   : > { %v1185_v0 = vpop.f32.mrf.mxu1  ;;  %v5017_v56 = vsel %vm1459_vm6, %v1475_v52, %v1476_v33  ;;  %v5024_v38 = vsel %vm4994_vm14, %v1370_v31, 0.0  ;;  %v1369_v50 = vmax.f32 %v1319_v3, 0.0  ;;  %v1014_v5 = vadd.f32 %v4649_v9, %v4637_v20  ;;  %v1948_v20 = vld [vmem:[%s5768_s3 + $0x180] sm:$0xff] }
 0x1cb   : > { %v5006_v19 = vpop.f32.mrf.mxu0  ;;  %v1372_v63 = vmax.f32 %v1334_v58, 0.0  ;;  %v1574_v2 = vrot.slane %v4970_v30, 1  ;;  %3247 = vrot.lane.b32.xlu1 %v3246_v47, %s3460_s17  ;;  %v1572_v12 = vrot.slane %v4894_v23, 1  ;;  %v1329_v59 = vadd.f32 %v1328_v7, %v1164_v15  ;;  %2865 = vmatprep.subr.mxu0 %v1948_v20 }
 0x1cc   : > { %v1188_v4 = vpop.f32.mrf.mxu1  ;;  %3242 = vrot.lane.b32.xlu0 %v3241_v55, %s3460_s17  ;;  %vm1398_vm3 = vcmp.ge.s32.totalorder %v4731_v16, 0  ;;  %vm1408_vm4 = vcmp.lt.s32.totalorder %v4731_v16, 16  ;;  %v1019_v17 = vadd.f32 %v4649_v9, %v4642_v37  ;;  %v1024_v40 = vadd.f32 %v4649_v9, %v4651_v1  ;;  %2866 = vmatpush3.msra.mxu0 %v1932_v25 }
 0x1cd   : > { %v1338_v14 = vpop.f32.mrf.mxu0  ;;  %v5055_v53 = vsel %vm1459_vm6, 0.0, %v1472_v10  ;;  %v1431_v7 = vsel %vm4994_vm14, %v1369_v50, 0.0  ;;  %v1479_v31 = vrot.slane %v5024_v38, 7  ;;  %v5065_v37 = vsel %vm5030_vm15, %v1372_v63, 0.0  ;;  %vm5146_vm8 = vmand %vm1398_vm3, %vm1408_vm4 }
 0x1ce   : > { %v1190_v46 = vpop.f32.mrf.mxu1  ;;  %v1478_v0 = vrot.slane %v1431_v7, 7  ;;  %v5068_v9 = vsel %vm318_vm0, %v1572_v12, %v1574_v2  ;;  %v5073_v6 = vsel %vm318_vm0, %v1571_v27, %v1572_v12  ;;  %v1371_v10 = vmax.f32 %v1329_v59, 0.0 }
 0x1cf   : > { %v3256_v1 = vpack.i.bf16 %v5068_v9, %v4956_v18  ;;  %vm1397_vm5 = vcmp.ge.s32.totalorder %v4722_v54, 0  ;;  %v1189_v11 = vadd.f32 %v1188_v4, %v1024_v40  ;;  %v1652_v47 = vrot.slane %v4873_v49, 2  ;;  %v2984_v55 = vpop.f32.mrf.mxu0 }
 0x1d0   : > { %v1576_v3 = vrot.slane %v5055_v53, 1  ;;  %v5081_v58 = vsel %vm1459_vm6, %v1478_v0, %v1479_v31  ;;  %v3251_v15 = vpack.i.bf16 %v5073_v6, %v5055_v53  ;;  %v1649_v27 = vrot.slane %v4848_v21, 2 }
 0x1d1   : > { %v5089_v4 = vsel %vm1459_vm6, %v1473_v13, 0.0  ;;  %v1174_v49 = vadd.f32 %v4868_v26, %v1009_v57  ;;  %3257 = vrot.lane.b32.xlu1 %v3256_v1, %s3460_s17  ;;  %v5095_v50 = vsel %vm5030_vm15, %v1371_v10, 0.0  ;;  %v1482_v63 = vrot.slane %v5065_v37, 7  ;;  %v1348_v40 = vpop.f32.mrf.mxu0 }
 0x1d2   : > { %3252 = vrot.lane.b32.xlu0 %v3251_v15, %s3460_s17  ;;  %v1481_v2 = vrot.slane %v5095_v50, 7  ;;  %v1577_v12 = vrot.slane %v4956_v18, 1  ;;  %v1650_v35 = vrot.slane %v4782_v43, 2  ;;  %v1654_v13 = vrot.slane %v4887_v44, 2 }
 0x1d3   : > { %v1339_v59 = vadd.f32 %v1338_v14, %v1174_v49  ;;  %v1354_v26 = vadd.f32 %v2984_v55, %v1189_v11  ;;  %v1655_v57 = vrot.slane %v4836_v36, 2  ;;  %v5107_v24 = vsel %vm1459_vm6, 0.0, %v1475_v52 }
 0x1d4   : > { %v5114_v46 = vsel %vm1459_vm6, %v1481_v2, %v1482_v63  ;;  %v5117_v61 = vsel %vm318_vm0, %v1576_v3, %v1577_v12  ;;  %v5120_v14 = vsel %vm429_vm1, %v1650_v35, %v1652_v47  ;;  %v1579_v20 = vrot.slane %v5089_v4, 1 }
 0x1d5   : > { %v5124_v48 = vsel %vm1459_vm6, 0.0, %v1478_v0  ;;  %vm1407_vm7 = vcmp.lt.s32.totalorder %v4722_v54, 16  ;;  %v3266_v52 = vpack.i.bf16 %v5120_v14, %v5117_v61  ;;  %v5132_v7 = vsel %vm1459_vm6, %v1476_v33, 0.0 }
 0x1d6   : > { %v1179_v25 = vadd.f32 %v4923_v62, %v1014_v5  ;;  %v1184_v1 = vadd.f32 %v4962_v51, %v1019_v17  ;;  %v5137_v10 = vsel %vm429_vm1, %v1649_v27, %v1650_v35  ;;  %v1373_v11 = vmax.f32 %v1339_v59, 0.0  ;;  %vm5168_vm9 = vmand %vm1397_vm5, %vm1407_vm7 }
 0x1d7   : > { %3267 = vrot.lane.b32.xlu1 %v3266_v52, %s3460_s17  ;;  %v3261_v0 = vpack.i.bf16 %v5107_v24, %v5137_v10  ;;  %v1376_v47 = vmax.f32 %v1354_v26, 0.0  ;;  %v5151_v62 = vsel %vm429_vm1, %v1654_v13, %v1655_v57  ;;  %v1581_v51 = vrot.slane %v5107_v24, 1 }
 0x1d8   : > { %v3276_v33 = vpack.i.bf16 %v5124_v48, %v5151_v62  ;;  %v5157_v5 = vsel %vm318_vm0, %v1577_v12, %v1579_v20  ;;  %v1349_v17 = vadd.f32 %v1348_v40, %v1184_v1  ;;  %v1584_v3 = vrot.slane %v5132_v7, 1 }
 0x1d9   : > { %v1344_v16 = vadd.f32 %v5006_v19, %v1179_v25  ;;  %3262 = vrot.lane.b32.xlu0 %v3261_v0, %s3460_s17  ;;  %v1582_v15 = vrot.slane %v5017_v56, 1  ;;  %v1586_v55 = vrot.slane %v5124_v48, 1  ;;  %v5174_v49 = vsel %vm5146_vm8, %v1376_v47, 0.0 }
 0x1da   : > { %v1375_v12 = vmax.f32 %v1349_v17, 0.0  ;;  %v1587_v19 = vrot.slane %v5081_v58, 1  ;;  %v1657_v35 = vrot.slane %v4911_v32, 2  ;;  %v1435_v13 = vsel %vm5168_vm9, %v1373_v11, 0.0 }
 0x1db   : > { %3277 = vrot.lane.b32.xlu1 %v3276_v33, %s3460_s17  ;;  %v3271_v54 = vpack.i.bf16 %v5157_v5, %v5017_v56  ;;  %v5184_v59 = vsel %vm318_vm0, %v1582_v15, %v1584_v3  ;;  %v1662_v26 = vrot.slane %v4970_v30, 2  ;;  %v5190_v52 = vsel %vm318_vm0, %v1581_v51, %v1582_v15 }
 0x1dc   : > { %v1437_v20 = vsel %vm5146_vm8, %v1375_v12, 0.0  ;;  %v1660_v32 = vrot.slane %v4894_v23, 2  ;;  %v1374_v40 = vmax.f32 %v1344_v16, 0.0  ;;  %v1488_v25 = vrot.slane %v5174_v49, 7 }
 0x1dd   : > { %3272 = vrot.lane.b32.xlu0 %v3271_v54, %s3460_s17  ;;  %v1487_v1 = vrot.slane %v1437_v20, 7  ;;  %v3286_v0 = vpack.i.bf16 %v5184_v59, %v5081_v58  ;;  %v1659_v11 = vrot.slane %v4975_v22, 2  ;;  %v1484_v30 = vrot.slane %v1435_v13, 7 }
 0x1de   : > { %v5199_v47 = vsel %vm429_vm1, %v1655_v57, %v1657_v35  ;;  %v5202_v28 = vsel %vm318_vm0, %v1586_v55, %v1587_v19  ;;  %v1664_v51 = vrot.slane %v5055_v53, 2  ;;  %v1536_v33 = vsel %vm1459_vm6, %v1479_v31, 0.0 }
 0x1df   : > { %v5209_v17 = vsel %vm1459_vm6, %v1487_v1, %v1488_v25  ;;  %3287 = vrot.lane.b32.xlu1 %v3286_v0, %s3460_s17  ;;  %v3281_v3 = vpack.i.bf16 %v5199_v47, %v5190_v52  ;;  %v1537_v57 = vsel %vm1459_vm6, %v1482_v63, 0.0  ;;  %v5220_v16 = vsel %vm1459_vm6, 0.0, %v1481_v2 }
 0x1e0   : > { %5858 = vst [vmem:[#allocation10_spill] sm:$0xff] %v5209_v17  ;;  %v5223_v38 = vsel %vm429_vm1, %v1660_v32, %v1662_v26  ;;  %v1665_v31 = vrot.slane %v4956_v18, 2  ;;  %v1436_v15 = vsel %vm5168_vm9, %v1374_v40, 0.0  ;;  %v1589_v55 = vrot.slane %v1536_v33, 1 }
 0x1e1   : > { %3282 = vrot.lane.b32.xlu0 %v3281_v3, %s3460_s17  ;;  %v3296_v37 = vpack.i.bf16 %v5223_v38, %v5202_v28  ;;  %v5232_v63 = vsel %vm1459_vm6, 0.0, %v1484_v30  ;;  %v5235_v50 = vsel %vm429_vm1, %v1659_v11, %v1660_v32  ;;  %v1592_v2 = vrot.slane %v5114_v46, 1 }
 0x1e2   : > { %v1594_v49 = vrot.slane %v1537_v57, 1  ;;  %v3291_v27 = vpack.i.bf16 %v5220_v16, %v5235_v50  ;;  %v1591_v12 = vrot.slane %v5220_v16, 1  ;;  %v1485_v35 = vrot.slane %v1436_v15, 7 }
 0x1e3   : > { %3297 = vrot.lane.b32.xlu1 %v3296_v37, %s3460_s17  ;;  %v5243_v13 = vsel %vm429_vm1, %v1664_v51, %v1665_v31  ;;  %v5246_v54 = vsel %vm318_vm0, %v1587_v19, %v1589_v55  ;;  %v1667_v0 = vrot.slane %v5089_v4, 2  ;;  %v1670_v51 = vrot.slane %v5017_v56, 2 }
 0x1e4   : > { %v3306_v26 = vpack.i.bf16 %v5232_v63, %v5243_v13  ;;  %v5252_v20 = vsel %vm1459_vm6, %v1484_v30, %v1485_v35  ;;  %v5255_v32 = vsel %vm318_vm0, %v1592_v2, %v1594_v49  ;;  %v3301_v40 = vpack.i.bf16 %v5246_v54, %v5114_v46 }
 0x1e5   : > { %3292 = vrot.lane.b32.xlu0 %v3291_v27, %s3460_s17  ;;  %v5262_v19 = vsel %vm318_vm0, %v1591_v12, %v1592_v2  ;;  %v3316_v11 = vpack.i.bf16 %v5255_v32, %v5252_v20  ;;  %v5268_v30 = vsel %vm429_vm1, %v1665_v31, %v1667_v0  ;;  %v1538_v4 = vsel %vm1459_vm6, %v1485_v35, 0.0 }
 0x1e6   : > { %v3311_v3 = vpack.i.bf16 %v5268_v30, %v5262_v19  ;;  %v1672_v15 = vrot.slane %v5132_v7, 2  ;;  %v1669_v37 = vrot.slane %v5107_v24, 2  ;;  %v1675_v31 = vrot.slane %v5081_v58, 2 }
 0x1e7   : > { %3307 = vrot.lane.b32.xlu1 %v3306_v26, %s3460_s17  ;;  %v1751_v2 = vrot.slane %v5252_v20, 1  ;;  %v1753_v49 = vrot.slane %v1538_v4, 1  ;;  %v1750_v27 = vrot.slane %v5232_v63, 1  ;;  %v5285_v12 = vsel %vm1459_vm6, %v1488_v25, 0.0 }
 0x1e8   : > { %v5279_v55 = vsel %vm429_vm1, %v1670_v51, %v1672_v15  ;;  %5859 = vst [vmem:[#allocation5_spill] sm:$0xff] %v5285_v12  ;;  %v5288_v35 = vsel %vm1459_vm6, 0.0, %v1487_v1  ;;  %v5293_v7 = vsel %vm429_vm1, %v1669_v37, %v1670_v51  ;;  %v1677_v26 = vrot.slane %v1536_v33, 2 }
 0x1e9   : > { %3302 = vrot.lane.b32.xlu0 %v3301_v40, %s3460_s17  ;;  %5860 = vst [vmem:[#allocation11_spill] sm:$0xff] %v5288_v35  ;;  %v1674_v40 = vrot.slane %v5124_v48, 2  ;;  %v1680_v0 = vrot.slane %v5114_v46, 2  ;;  %v1679_v25 = vrot.slane %v5220_v16, 2  ;;  %v1827_v51 = vrot.slane %v5209_v17, 1 }
 0x1ea   : > { %v5301_v1 = vsel %vm429_vm1, %v1675_v31, %v1677_v26  ;;  %v1829_v33 = vrot.slane %v5285_v12, 1  ;;  %v1826_v15 = vrot.slane %v5288_v35, 1  ;;  %v5318_v26 = vsel %vm318_vm0, %v1750_v27, %v1751_v2 }
 0x1eb   : > { %3317 = vrot.lane.b32.xlu1 %v3316_v11, %s3460_s17  ;;  %v1682_v11 = vrot.slane %v1537_v57, 2  ;;  %v5312_v57 = vsel %vm429_vm1, %v1674_v40, %v1675_v31  ;;  %v1774_v17 = vrot.slane %v1538_v4, 2  ;;  %v1771_v35 = vrot.slane %v5232_v63, 2 }
 0x1ec   : > { %v5327_v31 = vsel %vm429_vm1, %v1679_v25, %v1680_v0  ;;  %v1830_v40 = vsel %vm318_vm0, %v1827_v51, %v1829_v33 }
 0x1ed   : > { %3312 = vrot.lane.b32.xlu0 %v3311_v3, %s3460_s17  ;;  %v5304_v3 = vsel %vm318_vm0, %v1751_v2, %v1753_v49  ;;  %v5315_v37 = vsel %vm429_vm1, %v1680_v0, %v1682_v11  ;;  %v1772_v49 = vrot.slane %v5252_v20, 2  ;;  %v3321_v2 = vpack.i.bf16 %v5327_v31, %v5318_v26 }
 0x1ee   : > { %5861 = vst [vmem:[#allocation6_spill] sm:$0xff] %v5304_v3  ;;  %v3326_v12 = vpack.i.bf16 %v5315_v37, %v5304_v3  ;;  %v1828_v11 = vsel %vm318_vm0, %v1826_v15, %v1827_v51  ;;  %vm2553_vm0 = vcmask 516096  }
 0x1ef   : > { %1794 = vrot.lane.b32.xlu1 %v5279_v55, %s3460_s17  ;;  %v5334_v27 = vsel %vm429_vm1, %v1772_v49, %v1774_v17  ;;  %v5340_v3 = vsel %vm429_vm1, %v1771_v35, %v1772_v49  ;;  %v1645_v17 = vrot.slane %v4726_v39, 2 }
 0x1f0   : > { %5862 = vst [vmem:[#allocation14_spill] sm:$0xff] %v5334_v27  ;;  %v3336_v4 = vpack.i.bf16 %v5334_v27, %v1830_v40  ;;  %5863 = vst [vmem:[#allocation7_spill] sm:$0xff] %v5340_v3  ;;  %v3331_v0 = vpack.i.bf16 %v5340_v3, %v1828_v11  ;;  %v1647_v40 = vrot.slane %v4777_v8, 2  ;;  %v1970_v27 = vld [vmem:[%s5768_s3 + $0x230] sm:$0xff] }
 0x1f1   : > { %1792 = vrot.lane.b32.xlu0 %v5293_v7, %s3460_s17 }
 0x1f3   : > { %1798 = vrot.lane.b32.xlu1 %v5301_v1, %s3460_s17 }
 0x1f5   : > { %1796 = vrot.lane.b32.xlu0 %v5312_v57, %s3460_s17 }
 0x1f7   : > { %3327 = vrot.lane.b32.xlu1 %v3326_v12, %s3460_s17  ;;  %v1644_v12 = vrot.slane %v4793_v42, 2 }
 0x1f9   : > { %3322 = vrot.lane.b32.xlu0 %v3321_v2, %s3460_s17  ;;  %v1646_v35 = vsel %vm429_vm1, %v1644_v12, %v1645_v17 }
 0x1fb   : > { %3337 = vrot.lane.b32.xlu1 %v3336_v4, %s3460_s17 }
 0x1fd   : > { %3332 = vrot.lane.b32.xlu0 %v3331_v0, %s3460_s17  ;;  %v1648_v0 = vsel %vm429_vm1, %v1645_v17, %v1647_v40 }
 0x231   : > { %v3228_v25 = vpop.permute.xlu1 %3227 }
 0x232   : > { %v3229_v51 = vunpack.i.l.bf16 %v3228_v25  ;;  %v3230_v4 = vunpack.i.h.bf16 %v3228_v25 }
 0x233   : > { %v3223_v33 = vpop.permute.xlu0 %3222 }
 0x234   : > { %v3225_v15 = vunpack.i.h.bf16 %v3223_v33  ;;  %v3224_v2 = vunpack.i.l.bf16 %v3223_v33  ;;  %v1865_v33 = vsel %vm678_vm2, %v1648_v0, %v3229_v51  ;;  %v1849_v17 = vsel %vm678_vm2, %v4726_v39, %v3230_v4  ;;  %v1967_v4 = vld [vmem:[%s5768_s3 + $0x218] sm:$0xff] }
 0x236   : > { %v1864_v49 = vsel %vm678_vm2, %v1646_v35, %v3224_v2  ;;  %v1848_v11 = vsel %vm678_vm2, %v4793_v42, %v3225_v15  ;;  %v1969_v42 = vld [vmem:[%s5768_s3 + $0x228] sm:$0xff] }
 0x237   : > { %2075 = vmatprep.mubr.f32.mxu1 %v1864_v49 }
 0x238   : > { %2076 = vmatmul.mubr.f32.vlgmr.msra.gmra.mxu1 %v1848_v11 }
 0x239   : > { %v3238_v3 = vpop.permute.xlu1 %3237  ;;  %2986 = vmatpush3.msra.mxu1 %v4774_v45  ;;  %2080 = vmatprep.mubr.f32.mxu1 %v1865_v33  ;;  %v1968_v45 = vld [vmem:[%s5768_s3 + $0x220] sm:$0xff] }
 0x23a   : > { %v3233_v8 = vpop.permute.xlu0 %3232  ;;  %2987 = vmatprep.subr.mxu1 %v1970_v27  ;;  %v3239_v15 = vunpack.i.l.bf16 %v3238_v3  ;;  %v3240_v49 = vunpack.i.h.bf16 %v3238_v3 }
 0x23b   : > { %v3234_v12 = vunpack.i.l.bf16 %v3233_v8  ;;  %v3235_v25 = vunpack.i.h.bf16 %v3233_v8  ;;  %2988 = vmatpush3.msra.mxu1 %v1970_v27  ;;  %v1965_v8 = vld [vmem:[%s5768_s3 + $0x208] sm:$0xff] }
 0x23c   : > { %2081 = vmatmul.mubr.f32.gmra.mxu1 %v1849_v17  ;;  %2989 = vmatprep.subr.mxu1 %v1969_v42 }
 0x23d   : > { %v1866_v51 = vsel %vm678_vm2, %v5137_v10, %v3234_v12  ;;  %v3248_v2 = vpop.permute.xlu1 %3247  ;;  %2990 = vmatpush3.msra.mxu1 %v1969_v42  ;;  %v1850_v39 = vsel %vm678_vm2, %v4848_v21, %v3235_v25  ;;  %v1867_v10 = vsel %vm678_vm2, %v5120_v14, %v3239_v15  ;;  %v1851_v21 = vsel %vm678_vm2, %v4782_v43, %v3240_v49  ;;  %v1964_v43 = vld [vmem:[%s5768_s3 + $0x200] sm:$0xff] }
 0x23e   : > { %v3243_v40 = vpop.permute.xlu0 %3242  ;;  %2085 = vmatprep.mubr.f32.mxu1 %v1866_v51  ;;  %2991 = vmatprep.subr.mxu1 %v1968_v45  ;;  %v3249_v3 = vunpack.i.l.bf16 %v3248_v2  ;;  %v3250_v12 = vunpack.i.h.bf16 %v3248_v2 }
 0x23f   : > { %v3245_v35 = vunpack.i.h.bf16 %v3243_v40  ;;  %v3244_v27 = vunpack.i.l.bf16 %v3243_v40  ;;  %2992 = vmatpush3.msra.mxu1 %v1968_v45 }
 0x240   : > { %2086 = vmatmul.mubr.f32.gmra.mxu1 %v1850_v39  ;;  %2993 = vmatprep.subr.mxu1 %v1967_v4  ;;  %v1869_v17 = vsel %vm678_vm2, %v5199_v47, %v3249_v3  ;;  %v1853_v2 = vsel %vm678_vm2, %v4836_v36, %v3250_v12 }
 0x241   : > { %v1852_v11 = vsel %vm678_vm2, %v4887_v44, %v3245_v35  ;;  %2090 = vmatprep.mubr.f32.mxu1 %v1867_v10  ;;  %v1966_v44 = vld [vmem:[%s5768_s3 + $0x210] sm:$0xff]  ;;  %v1868_v14 = vsel %vm678_vm2, %v5151_v62, %v3244_v27  ;;  %2994 = vmatpush3.msra.mxu1 %v1967_v4 }
 0x242   : > { %2220 = vmatprep.mubr.f32.mxu0 %v1852_v11  ;;  %2995 = vmatprep.subr.mxu1 %v1966_v44 }
 0x243   : > { %v3258_v0 = vpop.permute.xlu1 %3257  ;;  %2996 = vmatpush3.msra.mxu1 %v1966_v44 }
 0x244   : > { %v3253_v33 = vpop.permute.xlu0 %3252  ;;  %2091 = vmatmul.mubr.f32.gmra.mxu1 %v1851_v21  ;;  %2997 = vmatprep.subr.mxu1 %v1965_v8  ;;  %v3259_v40 = vunpack.i.l.bf16 %v3258_v0  ;;  %v3260_v10 = vunpack.i.h.bf16 %v3258_v0 }
 0x245   : > { %2095 = vmatprep.mubr.f32.mxu1 %v1868_v14  ;;  %v3254_v42 = vunpack.i.l.bf16 %v3253_v33  ;;  %2998 = vmatpush3.msra.mxu1 %v1965_v8  ;;  %v3255_v51 = vunpack.i.h.bf16 %v3253_v33 }
 0x246   : > { %2999 = vmatprep.subr.mxu1 %v1964_v43  ;;  %v1871_v21 = vsel %vm678_vm2, %v5223_v38, %v3259_v40  ;;  %v1855_v0 = vsel %vm678_vm2, %v4894_v23, %v3260_v10 }
 0x247   : > { %3000 = vmatpush3.msra.mxu1 %v1964_v43  ;;  %v1870_v49 = vsel %vm678_vm2, %v5235_v50, %v3254_v42  ;;  %v1854_v4 = vsel %vm678_vm2, %v4975_v22, %v3255_v51 }
 0x248   : > { %2096 = vmatmul.mubr.f32.gmra.mxu1 %v1852_v11 }
 0x249   : > { %v3268_v25 = vpop.permute.xlu1 %3267  ;;  %2100 = vmatprep.mubr.f32.mxu1 %v1869_v17 }
 0x24a   : > { %v3270_v39 = vunpack.i.h.bf16 %v3268_v25  ;;  %v3269_v14 = vunpack.i.l.bf16 %v3268_v25 }
 0x24b   : > { %v3263_v15 = vpop.permute.xlu0 %3262 }
 0x24c   : > { %v3264_v45 = vunpack.i.l.bf16 %v3263_v15  ;;  %2101 = vmatmul.mubr.f32.gmra.mxu1 %v1853_v2  ;;  %v3265_v36 = vunpack.i.h.bf16 %v3263_v15  ;;  %v1881_v3 = vsel %vm678_vm2, %v4939_v34, %v3270_v39  ;;  %v1856_v25 = vsel %vm678_vm2, %v5055_v53, %v3269_v14 }
 0x24d   : > { %v3278_v35 = vpop.permute.xlu1 %3277  ;;  %2105 = vmatprep.mubr.f32.mxu1 %v1870_v49 }
 0x24e   : > { %v1880_v27 = vsel %vm678_vm2, %v4942_v60, %v3264_v45  ;;  %v3279_v44 = vunpack.i.l.bf16 %v3278_v35  ;;  %v1872_v22 = vsel %vm678_vm2, %v5243_v13, %v3265_v36  ;;  %v3280_v17 = vunpack.i.h.bf16 %v3278_v35 }
 0x24f   : > { %v3273_v11 = vpop.permute.xlu0 %3272  ;;  %2221 = vmatmul.mubr.f32.vlgmr.msra.gmra.mxu0 %v1880_v27 }
 0x250   : > { %2225 = vmatprep.mubr.f32.mxu0 %v1853_v2  ;;  %2106 = vmatmul.mubr.f32.gmra.mxu1 %v1854_v4  ;;  %v3274_v8 = vunpack.i.l.bf16 %v3273_v11  ;;  %v1882_v43 = vsel %vm678_vm2, %v5004_v29, %v3279_v44  ;;  %v3275_v42 = vunpack.i.h.bf16 %v3273_v11  ;;  %v1874_v53 = vsel %vm678_vm2, %v5293_v7, %v3280_v17 }
 0x251   : > { %2110 = vmatprep.mubr.f32.mxu1 %v1871_v21  ;;  %v3288_v33 = vpop.permute.xlu1 %3287 }
 0x252   : > { %v1873_v23 = vsel %vm678_vm2, %v5268_v30, %v3274_v8  ;;  %v1857_v40 = vsel %vm678_vm2, %v4956_v18, %v3275_v42  ;;  %v3289_v49 = vunpack.i.l.bf16 %v3288_v33 }
 0x253   : > { %v3283_v60 = vpop.permute.xlu0 %3282  ;;  %2226 = vmatmul.mubr.f32.gmra.mxu0 %v1881_v3 }
 0x254   : > { %2230 = vmatprep.mubr.f32.mxu0 %v1854_v4  ;;  %2111 = vmatmul.mubr.f32.gmra.mxu1 %v1855_v0  ;;  %v3285_v12 = vunpack.i.h.bf16 %v3283_v60  ;;  %v3284_v29 = vunpack.i.l.bf16 %v3283_v60  ;;  %v1875_v18 = vsel %vm678_vm2, %v5279_v55, %v3289_v49 }
 0x255   : > { %2115 = vmatprep.mubr.f32.mxu1 %v1872_v22  ;;  %v3298_v15 = vpop.permute.xlu1 %3297 }
 0x256   : > { %v1883_v45 = vsel %vm678_vm2, %v4999_v41, %v3285_v12  ;;  %v3300_v35 = vunpack.i.h.bf16 %v3298_v15  ;;  %v3290_v41 = vunpack.i.h.bf16 %v3288_v33  ;;  %v1858_v11 = vsel %vm678_vm2, %v5107_v24, %v3284_v29 }
 0x257   : > { %v3293_v34 = vpop.permute.xlu0 %3292  ;;  %2231 = vmatmul.mubr.f32.gmra.mxu0 %v1882_v43 }
 0x258   : > { %2235 = vmatprep.mubr.f32.mxu0 %v1855_v0  ;;  %2116 = vmatmul.mubr.f32.gmra.mxu1 %v1856_v25  ;;  %v3294_v51 = vunpack.i.l.bf16 %v3293_v34  ;;  %v3295_v10 = vunpack.i.h.bf16 %v3293_v34  ;;  %v1885_v21 = vsel %vm678_vm2, %v5068_v9, %v3300_v35  ;;  %v1859_v44 = vsel %vm678_vm2, %v5017_v56, %v3290_v41  ;;  %v5868_v41 = vld [vmem:[#allocation14_spill] sm:$0xff] }
 0x259   : > { %2120 = vmatprep.mubr.f32.mxu1 %v1873_v23  ;;  %v3308_v27 = vpop.permute.xlu1 %3307 }
 0x25a   : > { %v1884_v39 = vsel %vm678_vm2, %v5073_v6, %v3294_v51  ;;  %v3309_v4 = vunpack.i.l.bf16 %v3308_v27  ;;  %v3299_v6 = vunpack.i.l.bf16 %v3298_v15  ;;  %v1876_v24 = vsel %vm678_vm2, %v5312_v57, %v3295_v10 }
 0x25b   : > { %2236 = vmatmul.mubr.f32.gmra.mxu0 %v1883_v45  ;;  %v3303_v2 = vpop.permute.xlu0 %3302  ;;  %v3310_v22 = vunpack.i.h.bf16 %v3308_v27 }
 0x25c   : > { %2240 = vmatprep.mubr.f32.mxu0 %v1856_v25  ;;  %2121 = vmatmul.mubr.f32.gmra.mxu1 %v1857_v40  ;;  %v3304_v3 = vunpack.i.l.bf16 %v3303_v2  ;;  %v1886_v14 = vsel %vm678_vm2, %v5117_v61, %v3309_v4  ;;  %v3305_v9 = vunpack.i.h.bf16 %v3303_v2  ;;  %v1860_v8 = vsel %vm678_vm2, %v5124_v48, %v3299_v6 }
 0x25d   : > { %2125 = vmatprep.mubr.f32.mxu1 %v1874_v53  ;;  %v3318_v33 = vpop.permute.xlu1 %3317  ;;  %v1878_v48 = vsel %vm678_vm2, %v5327_v31, %v3310_v22 }
 0x25e   : > { %v1877_v56 = vsel %vm678_vm2, %v5301_v1, %v3304_v3  ;;  %v1861_v34 = vsel %vm678_vm2, %v5081_v58, %v3305_v9  ;;  %v3319_v42 = vunpack.i.l.bf16 %v3318_v33 }
 0x25f   : > { %2241 = vmatmul.mubr.f32.gmra.mxu0 %v1884_v39  ;;  %v3313_v36 = vpop.permute.xlu0 %3312  ;;  %v5866_v39 = vld [vmem:[#allocation6_spill] sm:$0xff] }
 0x260   : > { %2245 = vmatprep.mubr.f32.mxu0 %v1857_v40  ;;  %2126 = vmatmul.mubr.f32.gmra.mxu1 %v1858_v11  ;;  %v3315_v60 = vunpack.i.h.bf16 %v3313_v36  ;;  %v3314_v43 = vunpack.i.l.bf16 %v3313_v36  ;;  %v1879_v58 = vsel %vm678_vm2, %v5315_v37, %v3319_v42 }
 0x261   : > { %2130 = vmatprep.mubr.f32.mxu1 %v1875_v18  ;;  %v1795_v61 = vpop.permute.xlu1 %1794 }
 0x262   : > { %v1887_v12 = vsel %vm678_vm2, %v5157_v5, %v3315_v60  ;;  %v3320_v5 = vunpack.i.h.bf16 %v3318_v33  ;;  %v1862_v15 = vsel %vm678_vm2, %v5220_v16, %v3314_v43  ;;  %v1889_v51 = vsel %vm678_vm2, %v5184_v59, %v1795_v61 }
 0x263   : > { %2246 = vmatmul.mubr.f32.gmra.mxu0 %v1885_v21  ;;  %v1793_v0 = vpop.permute.xlu0 %1792 }
 0x264   : > { %2250 = vmatprep.mubr.f32.mxu0 %v1858_v11  ;;  %2131 = vmatmul.mubr.f32.gmra.mxu1 %v1859_v44  ;;  %v1888_v17 = vsel %vm678_vm2, %v5190_v52, %v1793_v0  ;;  %v1863_v52 = vsel %vm678_vm2, %v5114_v46, %v3320_v5  ;;  %v5869_v11 = vld [vmem:[#allocation5_spill] sm:$0xff] }
 0x265   : > { %2135 = vmatprep.mubr.f32.mxu1 %v1876_v24  ;;  %v1799_v23 = vpop.permute.xlu1 %1798  ;;  %v1846_v10 = vrot.slane %v5869_v11, 2 }
 0x266   : > { %v1891_v40 = vsel %vm678_vm2, %v5246_v54, %v1799_v23 }
 0x267   : > { %2251 = vmatmul.mubr.f32.gmra.mxu0 %v1886_v14  ;;  %v1797_v25 = vpop.permute.xlu0 %1796 }
 0x268   : > { %2255 = vmatprep.mubr.f32.mxu0 %v1859_v44  ;;  %2136 = vmatmul.mubr.f32.gmra.mxu1 %v1860_v8  ;;  %v1890_v29 = vsel %vm678_vm2, %v5202_v28, %v1797_v25 }
 0x269   : > { %2140 = vmatprep.mubr.f32.mxu1 %v1877_v56  ;;  %v3328_v2 = vpop.permute.xlu1 %3327 }
 0x26a   : > { %v3329_v46 = vunpack.i.l.bf16 %v3328_v2  ;;  %v3330_v49 = vunpack.i.h.bf16 %v3328_v2 }
 0x26b   : > { %2256 = vmatmul.mubr.f32.gmra.mxu0 %v1887_v12  ;;  %v3323_v45 = vpop.permute.xlu0 %3322 }
 0x26c   : > { %2260 = vmatprep.mubr.f32.mxu0 %v1860_v8  ;;  %2141 = vmatmul.mubr.f32.gmra.mxu1 %v1861_v34  ;;  %v3324_v16 = vunpack.i.l.bf16 %v3323_v45  ;;  %v3325_v59 = vunpack.i.h.bf16 %v3323_v45 }
 0x26d   : > { %2145 = vmatprep.mubr.f32.mxu1 %v1878_v48  ;;  %v3338_v53 = vpop.permute.xlu1 %3337 }
 0x26e   : > { %v1896_v28 = vsel %vm678_vm2, %v5232_v63, %v3324_v16 }
 0x26f   : > { %2261 = vmatmul.mubr.f32.gmra.mxu0 %v1888_v17 }
 0x270   : > { %2265 = vmatprep.mubr.f32.mxu0 %v1861_v34  ;;  %2146 = vmatmul.mubr.f32.gmra.mxu1 %v1862_v15 }
 0x271   : > { %2150 = vmatprep.mubr.f32.mxu1 %v1879_v58 }
 0x273   : > { %2266 = vmatmul.mubr.f32.gmra.mxu0 %v1889_v51 }
 0x274   : > { %2270 = vmatprep.mubr.f32.mxu0 %v1862_v15  ;;  %2151 = vmatmul.mubr.f32.gmra.mxu1 %v1863_v52 }
 0x275   : > { %3001 = vmatprep.mubr.msk.f32.mxu1 %vm678_vm2, %v5151_v62  ;;  %v3333_v62 = vpop.permute.xlu0 %3332 }
 0x276   : > { %v3334_v54 = vunpack.i.l.bf16 %v3333_v62  ;;  %v3335_v63 = vunpack.i.h.bf16 %v3333_v62 }
 0x277   : > { %2271 = vmatmul.mubr.f32.gmra.mxu0 %v1890_v29 }
 0x278   : > { %2275 = vmatprep.mubr.f32.mxu0 %v1863_v52  ;;  %3002 = vmatmul.mubr.msk.f32.vlgmr.msra.gmra.mxu1 %vm678_vm2, %v5199_v47  ;;  %v1892_v47 = vsel %vm678_vm2, %v5262_v19, %v3325_v59  ;;  %v3339_v19 = vunpack.i.l.bf16 %v3338_v53 }
 0x279   : > { %3004 = vmatprep.mubr.msk.f32.mxu1 %vm678_vm2, %v5235_v50  ;;  %v1897_v50 = vsel %vm678_vm2, %v5252_v20, %v3329_v46  ;;  %v3340_v20 = vunpack.i.h.bf16 %v3338_v53 }
 0x27b   : > { %2276 = vmatmul.mubr.f32.gmra.mxu0 %v1891_v40  ;;  %v1895_v27 = vsel %vm678_vm2, %v5866_v39, %v3340_v20 }
 0x27c   : > { %2280 = vmatprep.mubr.f32.mxu0 %v1896_v28  ;;  %3005 = vmatmul.mubr.msk.f32.gmra.mxu1 %vm678_vm2, %v5223_v38  ;;  %v1893_v38 = vsel %vm678_vm2, %v5255_v32, %v3330_v49  ;;  %v5865_v32 = vld [vmem:[#allocation10_spill] sm:$0xff] }
 0x27d   : > { %3007 = vmatprep.mubr.msk.f32.mxu1 %vm678_vm2, %v5243_v13  ;;  %v5864_v13 = vld [vmem:[#allocation11_spill] sm:$0xff] }
 0x27e   : > { %v1898_v35 = vsel %vm678_vm2, %v5864_v13, %v3334_v54 }
 0x27f   : > { %2281 = vmatmul.mubr.f32.gmra.mxu0 %v1892_v47 }
 0x280   : > { %2285 = vmatprep.mubr.f32.mxu0 %v1897_v50  ;;  %3008 = vmatmul.mubr.msk.f32.gmra.mxu1 %vm678_vm2, %v5268_v30  ;;  %v1894_v30 = vsel %vm678_vm2, %v5318_v26, %v3335_v63  ;;  %v5867_v26 = vld [vmem:[#allocation7_spill] sm:$0xff] }
 0x281   : > { %3010 = vmatprep.mubr.msk.f32.mxu1 %vm678_vm2, %v5293_v7  ;;  %v1899_v7 = vsel %vm678_vm2, %v5865_v32, %v3339_v19 }
 0x283   : > { %2286 = vmatmul.mubr.f32.gmra.mxu0 %v1893_v38 }
 0x284   : > { %2290 = vmatprep.mubr.f32.mxu0 %v1898_v35  ;;  %3011 = vmatmul.mubr.msk.f32.gmra.mxu1 %vm678_vm2, %v5279_v55  ;;  %v1843_v55 = vrot.slane %v5864_v13, 2 }
 0x285   : > { %3013 = vmatprep.mubr.msk.f32.mxu1 %vm678_vm2, %v5312_v57  ;;  %v1844_v57 = vrot.slane %v5865_v32, 2  ;;  %v5542_v32 = vld [vmem:[%s5769_s4] ss:$0 sm:$0xff] }
 0x287   : > { %2291 = vmatmul.mubr.f32.gmra.mxu0 %v1894_v30 }
 0x288   : > { %2295 = vmatprep.mubr.f32.mxu0 %v1899_v7  ;;  %3014 = vmatmul.mubr.msk.f32.gmra.mxu1 %vm678_vm2, %v5301_v1  ;;  %v1845_v1 = vsel %vm429_vm1, %v1843_v55, %v1844_v57 }
 0x289   : > { %3016 = vmatprep.mubr.msk.f32.mxu1 %vm678_vm2, %v5327_v31  ;;  %v1847_v31 = vsel %vm429_vm1, %v1844_v57, %v1846_v10  ;;  %vm2550_vm1 = vcmask 523265  }
 0x28b   : > { %2296 = vmatmul.mubr.f32.gmra.mxu0 %v1895_v27 }
 0x28c   : > { %3017 = vmatmul.mubr.msk.f32.gmra.mxu1 %vm678_vm2, %v5315_v37 }
 0x28d   : > { %3019 = vmatprep.mubr.msk.f32.mxu1 %vm678_vm2, %v5867_v26 }
 0x290   : > { %3020 = vmatmul.mubr.msk.f32.gmra.mxu1 %vm678_vm2, %v5868_v41 }
 0x291   : > { %3022 = vmatprep.mubr.msk.f32.mxu1 %vm678_vm2, %v1845_v1 }
 0x294   : > { %3023 = vmatmul.mubr.msk.f32.gmra.mxu1 %vm678_vm2, %v1847_v31 }
 0x2f8   : > { %v2787_v18 = vpop.f32.mrf.mxu1 }
 0x2fa   : > { %v2788_v37 = vpop.f32.mrf.mxu1 }
 0x2fb   : > { %v2789_v20 = vadd.f32 %v2788_v37, %v2787_v18 }
 0x2fc   : > { %v2790_v4 = vpop.f32.mrf.mxu1 }
 0x2fd   : > { %v2078_v18 = vadd.f32 %v2789_v20, %v5542_v32 }
 0x2fe   : > { %v2791_v36 = vpop.f32.mrf.mxu1 }
 0x2ff   : > { %v2792_v19 = vadd.f32 %v2791_v36, %v2790_v4 }
 0x300   : > { %v2793_v21 = vpop.f32.mrf.mxu1 }
 0x301   : > { %v2083_v55 = vadd.f32 %v2792_v19, %v5542_v32 }
 0x302   : > { %v2794_v6 = vpop.f32.mrf.mxu1 }
 0x303   : > { %v2795_v7 = vadd.f32 %v2794_v6, %v2793_v21 }
 0x304   : > { %v2796_v44 = vpop.f32.mrf.mxu1 }
 0x305   : > { %v2088_v21 = vadd.f32 %v2795_v7, %v5542_v32 }
 0x306   : > { %v2797_v3 = vpop.f32.mrf.mxu1 }
 0x307   : > { %v2798_v57 = vadd.f32 %v2797_v3, %v2796_v44 }
 0x308   : > { %v2799_v24 = vpop.f32.mrf.mxu1 }
 0x309   : > { %v2093_v3 = vadd.f32 %v2798_v57, %v5542_v32 }
 0x30a   : > { %v2800_v33 = vpop.f32.mrf.mxu1 }
 0x30b   : > { %v2801_v41 = vadd.f32 %v2800_v33, %v2799_v24 }
 0x30c   : > { %v2802_v60 = vpop.f32.mrf.mxu1 }
 0x30e   : > { %v2803_v9 = vpop.f32.mrf.mxu1 }
 0x30f   : > { %v2867_v14 = vpop.f32.mrf.mxu0  ;;  %v2804_v1 = vadd.f32 %v2803_v9, %v2802_v60 }
 0x310   : > { %v2805_v8 = vpop.f32.mrf.mxu1 }
 0x311   : > { %v2868_v0 = vpop.f32.mrf.mxu0  ;;  %v2103_v9 = vadd.f32 %v2804_v1, %v5542_v32 }
 0x312   : > { %v2806_v56 = vpop.f32.mrf.mxu1  ;;  %v2869_v26 = vadd.f32 %v2868_v0, %v2867_v14  ;;  %v2098_v14 = vadd.f32 %v2801_v41, %v5542_v32 }
 0x313   : > { %v2870_v22 = vpop.f32.mrf.mxu0  ;;  %v2807_v11 = vadd.f32 %v2806_v56, %v2805_v8 }
 0x314   : > { %v2808_v43 = vpop.f32.mrf.mxu1  ;;  %v2223_v60 = vadd.f32 %v2869_v26, %v2078_v18  ;;  %v3342_v18 = vld [vmem:[%s3593_s26 + $0x30] sm:$0xff] }
 0x315   : > { %v2871_v12 = vpop.f32.mrf.mxu0  ;;  %v2108_v0 = vadd.f32 %v2807_v11, %v5542_v32 }
 0x316   : > { %v2809_v34 = vpop.f32.mrf.mxu1  ;;  %v2872_v30 = vadd.f32 %v2871_v12, %v2870_v22 }
 0x317   : > { %v2873_v61 = vpop.f32.mrf.mxu0  ;;  %v2810_v4 = vadd.f32 %v2809_v34, %v2808_v43 }
 0x318   : > { %v2811_v48 = vpop.f32.mrf.mxu1  ;;  %v2228_v36 = vadd.f32 %v2872_v30, %v2083_v55 }
 0x319   : > { %v2874_v42 = vpop.f32.mrf.mxu0  ;;  %v2113_v12 = vadd.f32 %v2810_v4, %v5542_v32 }
 0x31a   : > { %v2812_v17 = vpop.f32.mrf.mxu1  ;;  %v2875_v24 = vadd.f32 %v2874_v42, %v2873_v61 }
 0x31b   : > { %v2876_v25 = vpop.f32.mrf.mxu0  ;;  %v2813_v8 = vadd.f32 %v2812_v17, %v2811_v48 }
 0x31c   : > { %v5509_v15 = vpop.f32.mrf.mxu1  ;;  %v2233_v55 = vadd.f32 %v2875_v24, %v2088_v21  ;;  %v3343_v21 = vld [vmem:[%s3593_s26 + $0x38] sm:$0xff] }
 0x31d   : > { %v2877_v5 = vpop.f32.mrf.mxu0  ;;  %v5572_v57 = vadd.f32 %v2813_v8, %v5542_v32 }
 0x31e   : > { %v5511_v23 = vpop.f32.mrf.mxu1  ;;  %v2878_v37 = vadd.f32 %v2877_v5, %v2876_v25 }
 0x31f   : > { %v2879_v58 = vpop.f32.mrf.mxu0  ;;  %v2816_v5 = vadd.f32 %v5511_v23, %v5509_v15  ;;  %v3341_v23 = vld [vmem:[%s3593_s26 + $0x40] sm:$0x3] }
 0x320   : > { %v2817_v45 = vpop.f32.mrf.mxu1  ;;  %v2238_v61 = vadd.f32 %v2878_v37, %v2093_v3 }
 0x321   : > { %v2880_v51 = vpop.f32.mrf.mxu0  ;;  %v2123_v1 = vadd.f32 %v2816_v5, %v5542_v32 }
 0x322   : > { %v2818_v29 = vpop.f32.mrf.mxu1  ;;  %v2881_v42 = vadd.f32 %v2880_v51, %v2879_v58 }
 0x323   : > { %v2882_v52 = vpop.f32.mrf.mxu0  ;;  %v2819_v19 = vadd.f32 %v2818_v29, %v2817_v45 }
 0x324   : > { %v5513_v2 = vpop.f32.mrf.mxu1 }
 0x325   : > { %v2883_v16 = vpop.f32.mrf.mxu0  ;;  %v5583_v11 = vadd.f32 %v2819_v19, %v5542_v32 }
 0x326   : > { %v5517_v40 = vpop.f32.mrf.mxu1  ;;  %v2884_v25 = vadd.f32 %v2883_v16, %v2882_v52 }
 0x327   : > { %v5515_v59 = vpop.f32.mrf.mxu0  ;;  %v2822_v58 = vadd.f32 %v5517_v40, %v5513_v2  ;;  %v2243_v2 = vadd.f32 %v2881_v42, %v2098_v14 }
 0x328   : > { %v5521_v28 = vpop.f32.mrf.mxu1 }
 0x329   : > { %v5519_v46 = vpop.f32.mrf.mxu0 }
 0x32a   : > { %v5523_v49 = vpop.f32.mrf.mxu1  ;;  %v2887_v26 = vadd.f32 %v5519_v46, %v5515_v59  ;;  %v2248_v46 = vadd.f32 %v2884_v25, %v2103_v9 }
 0x32b   : > { %v2888_v62 = vpop.f32.mrf.mxu0  ;;  %v2825_v40 = vadd.f32 %v5523_v49, %v5521_v28 }
 0x32c   : > { %v5525_v54 = vpop.f32.mrf.mxu1  ;;  %v2253_v8 = vadd.f32 %v2887_v26, %v2108_v0  ;;  %v3345_v0 = vld [vmem:[%s3593_s26 + $0x48] sm:$0xff] }
 0x32d   : > { %v2889_v47 = vpop.f32.mrf.mxu0  ;;  %v5612_v5 = vadd.f32 %v2825_v40, %v5542_v32 }
 0x32e   : > { %v5529_v53 = vpop.f32.mrf.mxu1  ;;  %v2890_v41 = vadd.f32 %v2889_v47, %v2888_v62 }
 0x32f   : > { %v5527_v50 = vpop.f32.mrf.mxu0 }
 0x330   : > { %v5533_v38 = vpop.f32.mrf.mxu1  ;;  %v2258_v9 = vadd.f32 %v2890_v41, %v2113_v12  ;;  %v2828_v12 = vadd.f32 %v5529_v53, %v5525_v54 }
 0x331   : > { %v5531_v63 = vpop.f32.mrf.mxu0 }
 0x332   : > { %v5537_v35 = vpop.f32.mrf.mxu1 }
 0x333   : > { %v5535_v13 = vpop.f32.mrf.mxu0 }
 0x334   : > { %v5546_v27 = vpop.f32.mrf.mxu1 }
 0x335   : > { %v5544_v39 = vpop.f32.mrf.mxu0 }
 0x336   : > { %v5551_v31 = vpop.f32.mrf.mxu1 }
 0x337   : > { %v5549_v10 = vpop.f32.mrf.mxu0  ;;  %v2834_v41 = vadd.f32 %v5551_v31, %v5546_v27  ;;  %v3348_v27 = vld [vmem:[%s3593_s26 + $0x60] sm:$0xff] }
 0x338   : > { %v3003_v44 = vpop.f32.mrf.mxu1 }
 0x339   : > { %v5555_v6 = vpop.f32.mrf.mxu0  ;;  %v2373_v33 = vadd.f32 %v3003_v44, %v2228_v36  ;;  %v5597_v36 = vadd.f32 %v2822_v58, %v5542_v32 }
 0x33a   : > { %v2367_v56 = vpop.f32.mrf.mxu1 }
 0x33b   : > { %v5562_v22 = vpop.f32.mrf.mxu0  ;;  %v2447_v43 = vmul.f32 0.2, %v2373_v33  ;;  %v2368_v34 = vadd.f32 %v2367_v56, %v2223_v60  ;;  %v3344_v33 = vld [vmem:[%s3593_s26 + $0x58] sm:$0x3]  ;;  %v2893_v56 = vadd.f32 %v5531_v63, %v5527_v50 }
 0x33c   : > { %v3006_v48 = vpop.f32.mrf.mxu1 }
 0x33d   : > { %v2901_v20 = vpop.f32.mrf.mxu0  ;;  %v2479_v17 = vrot.slane %v2447_v43, 7  ;;  %v2446_v30 = vmul.f32 0.2, %v2368_v34  ;;  %v2383_v7 = vadd.f32 %v3006_v48, %v2238_v61  ;;  %v2896_v43 = vadd.f32 %v5544_v39, %v5535_v13 }
 0x33e   : > { %v2377_v15 = vpop.f32.mrf.mxu1  ;;  %v2902_v13 = vadd.f32 %v2901_v20, %v5562_v22  ;;  %v3347_v22 = vld [vmem:[%s3593_s26 + $0x70] sm:$0x3] }
 0x33f   : > { %v5578_v51 = vpop.f32.mrf.mxu0  ;;  %v2528_v45 = vadd.f32 %v3341_v23, %v2479_v17  ;;  %v2478_v52 = vrot.slane %v2446_v30, 7  ;;  %v2449_v29 = vmul.f32 0.2, %v2383_v7  ;;  %v2378_v16 = vadd.f32 %v2377_v15, %v2233_v55  ;;  %v3346_v7 = vld [vmem:[%s3593_s26 + $0x50] sm:$0xff] }
 0x340   : > { %v3009_v62 = vpop.f32.mrf.mxu1  ;;  %v2268_v15 = vadd.f32 %v2896_v43, %v2123_v1  ;;  %v3349_v1 = vld [vmem:[%s3593_s26 + $0x68] sm:$0xff] }
 0x341   : > { %v5585_v59 = vpop.f32.mrf.mxu0  ;;  %2554 = vst.msk [vmem:[%s5590_s30 + $0xf] sm:$0x1] %vm2553_vm0, %v2528_v45  ;;  %v2480_v47 = vsel %vm1459_vm6, %v2478_v52, %v2479_v17  ;;  %v2526_v37 = vadd.f32 %v3342_v18, %v2478_v52  ;;  %v2482_v4 = vrot.slane %v2449_v29, 7  ;;  %v2448_v28 = vmul.f32 0.2, %v2378_v16 }
 0x342   : > { %v2527_v44 = vadd.f32 %v3343_v21, %v2480_v47  ;;  %v2393_v49 = vadd.f32 %v3009_v62, %v2248_v46  ;;  %v2387_v24 = vpop.f32.mrf.mxu1  ;;  %v2263_v45 = vadd.f32 %v2893_v56, %v5572_v57  ;;  %v2899_v52 = vadd.f32 %v5555_v6, %v5549_v10  ;;  %v3350_v47 = vld [vmem:[%s3593_s26 + $0x88] sm:$0x3]  ;;  %v3352_v56 = vld [vmem:[%s3593_s26 + $0x80] sm:$0xff] }
 0x343   : > { %v5600_v3 = vpop.f32.mrf.mxu0  ;;  %2551 = vst.msk [vmem:[%s5590_s30 - $0x1] sm:$0xfe] %vm2550_vm1, %v2526_v37  ;;  %v2531_v60 = vadd.f32 %v3344_v33, %v2482_v4  ;;  %v2388_v14 = vadd.f32 %v2387_v24, %v2243_v2  ;;  %v2481_v61 = vrot.slane %v2448_v28, 7  ;;  %v2143_v46 = vadd.f32 %v2828_v12, %v5542_v32 }
 0x344   : > { %2552 = vst.msk [vmem:[%s5590_s30 + $0x7] sm:$0xff] %vm678_vm2, %v2527_v44  ;;  %v2451_v42 = vmul.f32 0.2, %v2393_v49  ;;  %v3012_v25 = vpop.f32.mrf.mxu1  ;;  %v2831_v6 = vadd.f32 %v5537_v35, %v5533_v38  ;;  %v2905_v21 = vadd.f32 %v5585_v59, %v5578_v51  ;;  %v2153_v35 = vadd.f32 %v2834_v41, %v5542_v32 }
 0x345   : > { %v2907_v34 = vpop.f32.mrf.mxu0  ;;  %2557 = vst.msk [vmem:[%s5590_s30 + $0x1f] sm:$0x1] %vm2553_vm0, %v2531_v60  ;;  %v2450_v50 = vmul.f32 0.2, %v2388_v14  ;;  %v2403_v63 = vadd.f32 %v3012_v25, %v2258_v9  ;;  %v2483_v39 = vsel %vm1459_vm6, %v2481_v61, %v2482_v4  ;;  %v2529_v19 = vadd.f32 %v3345_v0, %v2481_v61  ;;  %v3354_v0 = vld [vmem:[%s3593_s26 + $0x90] sm:$0xff] }
 0x346   : > { %v2485_v17 = vrot.slane %v2451_v42, 7  ;;  %v2397_v30 = vpop.f32.mrf.mxu1  ;;  %v2530_v55 = vadd.f32 %v3346_v7, %v2483_v39  ;;  %v2278_v4 = vadd.f32 %v2902_v13, %v5597_v36  ;;  %v2908_v44 = vadd.f32 %v2907_v34, %v5600_v3  ;;  %v3351_v3 = vld [vmem:[%s3593_s26 + $0x78] sm:$0xff] }
 0x347   : > { %v2909_v48 = vpop.f32.mrf.mxu0  ;;  %v2484_v54 = vrot.slane %v2450_v50, 7  ;;  %v2453_v53 = vmul.f32 0.2, %v2403_v63  ;;  %v2398_v26 = vadd.f32 %v2397_v30, %v2253_v8  ;;  %2555 = vst.msk [vmem:[%s5590_s30 + $0xf] sm:$0xfe] %vm2550_vm1, %v2529_v19  ;;  %v2273_v60 = vadd.f32 %v2899_v52, %v5583_v11  ;;  %v3355_v7 = vld [vmem:[%s3593_s26 + $0x98] sm:$0xff] }
 0x348   : > { %v2534_v20 = vadd.f32 %v3347_v22, %v2485_v17  ;;  %v3015_v23 = vpop.f32.mrf.mxu1  ;;  %2556 = vst.msk [vmem:[%s5590_s30 + $0x17] sm:$0xff] %vm678_vm2, %v2530_v55  ;;  %v3353_v11 = vld [vmem:[%s3593_s26 + $0xa0] sm:$0x3]  ;;  %v2288_v50 = vadd.f32 %v2908_v44, %v2143_v46  ;;  %v2283_v13 = vadd.f32 %v2905_v21, %v5612_v5  ;;  %v3361_v21 = vld [vmem:[%s3593_s26 + $0xc8] sm:$0xff] }
 0x349   : > { %v2910_v58 = vpop.f32.mrf.mxu0  ;;  %v2486_v29 = vsel %vm1459_vm6, %v2484_v54, %v2485_v17  ;;  %v2532_v31 = vadd.f32 %v3348_v27, %v2484_v54  ;;  %v2488_v16 = vrot.slane %v2453_v53, 7  ;;  %v2452_v2 = vmul.f32 0.2, %v2398_v26  ;;  %v3356_v53 = vld [vmem:[%s3593_s26 + $0xb8] sm:$0x3] }
 0x34a   : > { %2560 = vst.msk [vmem:[%s5590_s30 + $0x2f] sm:$0x1] %vm2553_vm0, %v2534_v20  ;;  %v2533_v62 = vadd.f32 %v3349_v1, %v2486_v29  ;;  %v2413_v40 = vadd.f32 %v3015_v23, %v2268_v15  ;;  %v2407_v10 = vpop.f32.mrf.mxu1  ;;  %v2911_v25 = vadd.f32 %v2910_v58, %v2909_v48  ;;  %v2148_v48 = vadd.f32 %v2831_v6, %v5542_v32 }
 0x34b   : > { %v2912_v57 = vpop.f32.mrf.mxu0  ;;  %2558 = vst.msk [vmem:[%s5590_s30 + $0x1f] sm:$0xfe] %vm2550_vm1, %v2532_v31  ;;  %v2537_v18 = vadd.f32 %v3350_v47, %v2488_v16  ;;  %v2408_v37 = vadd.f32 %v2407_v10, %v2263_v45  ;;  %v2487_v49 = vrot.slane %v2452_v2, 7  ;;  %v3357_v45 = vld [vmem:[%s3593_s26 + $0xa8] sm:$0xff]  ;;  %v3358_v31 = vld [vmem:[%s3593_s26 + $0xb0] sm:$0xff]  ;;  %v3360_v47 = vld [vmem:[%s3593_s26 + $0xc0] sm:$0xff] }
 0x34c   : > { %2559 = vst.msk [vmem:[%s5590_s30 + $0x27] sm:$0xff] %vm678_vm2, %v2533_v62  ;;  %v2455_v24 = vmul.f32 0.2, %v2413_v40  ;;  %v3018_v38 = vpop.f32.mrf.mxu1  ;;  %v2293_v15 = vadd.f32 %v2911_v25, %v2148_v48  ;;  %v3359_v40 = vld [vmem:[%s3593_s26 + $0xd0] sm:$0x3] }
 0x34d   : > { %v2913_v28 = vpop.f32.mrf.mxu0  ;;  %2563 = vst.msk [vmem:[%s5590_s30 + $0x3f] sm:$0x1] %vm2553_vm0, %v2537_v18  ;;  %v2454_v33 = vmul.f32 0.2, %v2408_v37  ;;  %v2423_v36 = vadd.f32 %v3018_v38, %v2278_v4  ;;  %v2489_v59 = vsel %vm1459_vm6, %v2487_v49, %v2488_v16  ;;  %v2535_v14 = vadd.f32 %v3351_v3, %v2487_v49 }
 0x34e   : > { %v2914_v51 = vadd.f32 %v2913_v28, %v2912_v57  ;;  %v2491_v9 = vrot.slane %v2455_v24, 7  ;;  %v2417_v8 = vpop.f32.mrf.mxu1  ;;  %v2536_v43 = vadd.f32 %v3352_v56, %v2489_v59  ;;  %v3362_v28 = vld [vmem:[%s3593_s26 + $0xe8] sm:$0x3] }
 0x34f   : > { %v2490_v34 = vrot.slane %v2454_v33, 7  ;;  %v2457_v61 = vmul.f32 0.2, %v2423_v36  ;;  %v2418_v42 = vadd.f32 %v2417_v8, %v2273_v60  ;;  %2561 = vst.msk [vmem:[%s5590_s30 + $0x2f] sm:$0xfe] %vm2550_vm1, %v2535_v14  ;;  %v3364_v36 = vld [vmem:[%s3593_s26 + $0xe0] sm:$0xff] }
 0x350   : > { %v2540_v12 = vadd.f32 %v3353_v11, %v2491_v9  ;;  %v3021_v63 = vpop.f32.mrf.mxu1  ;;  %2562 = vst.msk [vmem:[%s5590_s30 + $0x37] sm:$0xff] %vm678_vm2, %v2536_v43  ;;  %v2298_v20 = vadd.f32 %v2914_v51, %v2153_v35  ;;  %v3363_v35 = vld [vmem:[%s3593_s26 + $0xd8] sm:$0xff] }
 0x351   : > { %v2492_v39 = vsel %vm1459_vm6, %v2490_v34, %v2491_v9  ;;  %v2538_v19 = vadd.f32 %v3354_v0, %v2490_v34  ;;  %v2494_v17 = vrot.slane %v2457_v61, 7  ;;  %v2456_v30 = vmul.f32 0.2, %v2418_v42 }
 0x352   : > { %2566 = vst.msk [vmem:[%s5590_s30 + $0x4f] sm:$0x1] %vm2553_vm0, %v2540_v12  ;;  %v2539_v55 = vadd.f32 %v3355_v7, %v2492_v39  ;;  %v2433_v54 = vadd.f32 %v3021_v63, %v2288_v50  ;;  %v2427_v5 = vpop.f32.mrf.mxu1 }
 0x353   : > { %2564 = vst.msk [vmem:[%s5590_s30 + $0x3f] sm:$0xfe] %vm2550_vm1, %v2538_v19  ;;  %v2543_v26 = vadd.f32 %v3356_v53, %v2494_v17  ;;  %v2493_v41 = vrot.slane %v2456_v30, 7  ;;  %v2428_v22 = vadd.f32 %v2427_v5, %v2283_v13 }
 0x354   : > { %2565 = vst.msk [vmem:[%s5590_s30 + $0x47] sm:$0xff] %vm678_vm2, %v2539_v55  ;;  %v2459_v32 = vmul.f32 0.2, %v2433_v54  ;;  %v3024_v58 = vpop.f32.mrf.mxu1 }
 0x355   : > { %2569 = vst.msk [vmem:[%s5590_s30 + $0x5f] sm:$0x1] %vm2553_vm0, %v2543_v26  ;;  %v2495_v23 = vsel %vm1459_vm6, %v2493_v41, %v2494_v17  ;;  %v2541_v52 = vadd.f32 %v3357_v45, %v2493_v41  ;;  %v2458_v29 = vmul.f32 0.2, %v2428_v22  ;;  %v2443_v27 = vadd.f32 %v3024_v58, %v2298_v20 }
 0x356   : > { %v2542_v16 = vadd.f32 %v3358_v31, %v2495_v23  ;;  %v2497_v46 = vrot.slane %v2459_v32, 7  ;;  %v2437_v1 = vpop.f32.mrf.mxu1 }
 0x357   : > { %2567 = vst.msk [vmem:[%s5590_s30 + $0x4f] sm:$0xfe] %vm2550_vm1, %v2541_v52  ;;  %v2496_v62 = vrot.slane %v2458_v29, 7  ;;  %v2461_v57 = vmul.f32 0.2, %v2443_v27  ;;  %v2438_v2 = vadd.f32 %v2437_v1, %v2293_v15 }
 0x358   : > { %2568 = vst.msk [vmem:[%s5590_s30 + $0x57] sm:$0xff] %vm678_vm2, %v2542_v16  ;;  %v2546_v10 = vadd.f32 %v3359_v40, %v2497_v46 }
 0x359   : > { %v2498_v6 = vsel %vm1459_vm6, %v2496_v62, %v2497_v46  ;;  %v2544_v18 = vadd.f32 %v3360_v47, %v2496_v62  ;;  %v2500_v37 = vrot.slane %v2461_v57, 7  ;;  %v2460_v4 = vmul.f32 0.2, %v2438_v2 }
 0x35a   : > { %2572 = vst.msk [vmem:[%s5590_s30 + $0x6f] sm:$0x1] %vm2553_vm0, %v2546_v10  ;;  %v2545_v44 = vadd.f32 %v3361_v21, %v2498_v6 }
 0x35b   : > { %2570 = vst.msk [vmem:[%s5590_s30 + $0x5f] sm:$0xfe] %vm2550_vm1, %v2544_v18  ;;  %v2549_v49 = vadd.f32 %v3362_v28, %v2500_v37  ;;  %v2499_v24 = vrot.slane %v2460_v4, 7 }
 0x35c   : > { %2571 = vst.msk [vmem:[%s5590_s30 + $0x67] sm:$0xff] %vm678_vm2, %v2545_v44 }
 0x35d   : > { %2575 = vst.msk [vmem:[%s5590_s30 + $0x7f] sm:$0x1] %vm2553_vm0, %v2549_v49  ;;  %v2501_v38 = vsel %vm1459_vm6, %v2499_v24, %v2500_v37  ;;  %v2547_v33 = vadd.f32 %v3363_v35, %v2499_v24 }
 0x35e   : > { %v2548_v60 = vadd.f32 %v3364_v36, %v2501_v38 }
 0x35f   : > { %2573 = vst.msk [vmem:[%s5590_s30 + $0x6f] sm:$0xfe] %vm2550_vm1, %v2547_v33 }
 0x360   : > { %2574 = vst.msk [vmem:[%s5590_s30 + $0x77] sm:$0xff] %vm678_vm2, %v2548_v60 }
 0x361   : > { %3378 = shalt.err (!%p3375_p6)
}
 0x362   : > { %s3379_s26 = scalar_lea.hbm %s5703_s13, 2048  ;;  %s3383_s21 = scalar_lea.hbm %s5770_s5, 8192 }
 0x363   : > { %p3380_p7 = scmp.ne.s32.totalorder %s5703_s13, %s3379_s26  ;;  %p3384_p11 = scmp.lt.s32.totalorder %s5703_s13, %s5770_s5 }
 0x364   : > { %p3385_p12 = scmp.lt.s32.totalorder %s3383_s21, %s3379_s26 }
 0x365   : > { %p3381_p9 = pnand %p3380_p7, %p3545_p3 }
 0x366   : > { %p3386_p13 = por %p3385_p12, %p3384_p11 }
 0x367   : > { %p3382_p10 = pneg %p3381_p9 }
 0x369   : > { %p3387_p0 = pnand %p3386_p13, %p3382_p10 }
 0x36b   : > { %3390 = shalt.err (!%p3387_p0)
}
 0x36c   : > { %s3462_s9 = smov 128   ;;  %s3463_s16 = smov 8  }
 0x36d   : > { %3026 = dma.vmem_to_hbm [thread:$0]  (%p3545_p3), %s5705_s12, 2048, %s5703_s13, %s5714_s14, %s3462_s9, %s3462_s9, %s3463_s16  }
 0x36e PF: > { %p3032_p1 = scmp.ge.s32.totalorder %s3457_s25, 2  ;;  %s2608_s27 = sand.u32 1, %s3429_s18  }
 0x36f   : > { %s2609_s8 = scalar_lea.sflag [#allocation3], %s2608_s27 }
 0x370   : > { %p3029_p2 = pnand %p3032_p1, %p3554_p8 }
 0x372   : > { %p3030_p4 = pneg %p3029_p2 }
 0x374   : > { %3424 = dma.done.wait (%p3030_p4), %s2609_s8, 2048  }
 0x375   : > { %3426 = vsyncadd (%p3030_p4), %s2609_s8, 4294965248  ;;  %s18_s25 = sadd.s32 1, %s3457_s25   ;;  %s5870_s18 = smov %s3433_s19 }
 0x376   : > { %p15_p5 = scmp.ge.s32.totalorder %s18_s25, 6   ;;  %s5871_s19 = smov %s3437_s20 }
 0x377   : > { %s5872_s20 = smov %s3563_s11  ;;  %s5873_s21 = smov %s3449_s23 }
 0x378   : > { %s5874_s22 = smov %s3453_s24  ;;  %s5875_s23 = smov %s5878_s28 }
 0x379   : > { %s5876_s24 = smov %s5882_s29  ;;  %17 = sbr.rel (!%p15_p5) target bundleno = 5 (0x5), region = 75 }
 0x37e   :  { %2614 = vsyncpa [#allocation3], 1 }
 0x37f   :  { %2616 = vsyncpa [#allocation3 + $0x1], 1 }

</bundles_post_ra>
